<compile_context>
chip_gen: v5e
topology: v5e:2x2
jax: 0.10.0
libtpu: 0.0.40
codegen_flags: <defaults>
</compile_context>

<pallas_src>
import jax
import jax.numpy as jnp
from jax.experimental import pallas as pl
from jax.experimental.pallas import tpu as pltpu


def _sq_diff_kernel(x_ref, y_ref, o_ref):
    d = x_ref[...] - y_ref[...]
    o_ref[...] = d * d


_TARGET_BLOCK_BYTES = 4 << 20   # ~4 MiB per input block (24 MiB pipeline footprint)
_SMALL_INPUT_BYTES = 4 << 20    # below this, launch/pipeline overhead beats Pallas
_MIN_GRID_STEPS = 4             # keep both v7x TensorCores + the pipeline busy
_VMEM_LIMIT_BYTES = 48 << 20    # explicit: above v5e's 16 MiB scoped default,
                                # below v7x's 64 MiB physical VMEM


def _xla_sq_diff(x, y):
    d = x - y
    return d * d


def squared_difference(x, y):
    """Elementwise (x - y)**2, matching torch.pow(x - y, 2) semantics."""
    x = jnp.asarray(x)
    y = jnp.asarray(y)

    # Broadcasting / mixed dtypes: fused XLA handles this at the roofline
    # without materializing the broadcast, so don't funnel through the kernel.
    if x.shape != y.shape or x.dtype != y.dtype:
        return _xla_sq_diff(x, y)

    orig_shape = x.shape
    total = int(x.size)
    itemsize = jnp.dtype(x.dtype).itemsize

    # Tiny inputs: kernel launch + pipeline prologue dominates; XLA is faster.
    if total == 0 or total * itemsize < _SMALL_INPUT_BYTES:
        return _xla_sq_diff(x, y)

    # Widest lane-dense row width (multiple of 128) that divides the element
    # count exactly: the reshape to 2D is then a free bitcast -> zero pad/slice
    # copies.  A block spans the full row width of a contiguous buffer, so
    # 128/256/512 all give the same single contiguous DMA and unmasked stores.
    lanes = None
    for cand in (512, 256, 128):
        if total % cand == 0:
            lanes = cand
            break
    if lanes is None:
        # Element count not a multiple of 128: any Pallas route needs pad/tail
        # copies (extra HBM passes); fused XLA is already at the HBM roofline.
        return _xla_sq_diff(x, y)

    rows = total // lanes

    # Dtype-aware sublane multiple: f32 -> 8, bf16 -> 16, int8/fp8 -> 32.
    sublane = max(8, 32 // itemsize)

    # ~4 MiB per input block, clamped to the array extent.
    block_rows = (_TARGET_BLOCK_BYTES // (lanes * itemsize)) // sublane * sublane
    block_rows = max(sublane, min(block_rows, (rows // sublane) * sublane))

    # Ensure enough grid steps for megacore sharding + pipeline overlap.
    while pl.cdiv(rows, block_rows) < _MIN_GRID_STEPS and block_rows > sublane:
        block_rows = max(sublane, (block_rows // 2) // sublane * sublane)

    grid_steps = pl.cdiv(rows, block_rows)

    x2 = x.reshape(rows, lanes)   # free bitcast (exact divisor)
    y2 = y.reshape(rows, lanes)

    out2 = pl.pallas_call(
        _sq_diff_kernel,
        out_shape=jax.ShapeDtypeStruct((rows, lanes), x.dtype),
        grid=(grid_steps,),
        in_specs=[
            pl.BlockSpec((block_rows, lanes), lambda i: (i, 0)),
            pl.BlockSpec((block_rows, lanes), lambda i: (i, 0)),
        ],
        out_specs=pl.BlockSpec((block_rows, lanes), lambda i: (i, 0)),
        compiler_params=pltpu.CompilerParams(
            dimension_semantics=("parallel",),
            vmem_limit_bytes=_VMEM_LIMIT_BYTES,
        ),
        cost_estimate=pl.CostEstimate(
            flops=2 * total,
            transcendentals=0,
            bytes_accessed=3 * total * itemsize,
        ),
    )(x2, y2)

    return out2.reshape(orig_shape)


def _check(x, y):
    out = jax.block_until_ready(squared_difference(x, y))
    ref = jnp.square(jnp.asarray(x) - jnp.asarray(y))
    assert out.shape == ref.shape
    assert jnp.allclose(out, ref, atol=1e-6, rtol=1e-6)
    return out


if __name__ == "__main__":
    key = jax.random.PRNGKey(0)
    kx, ky = jax.random.split(key)

    # 1) Small NCHW shape matching the module's typical usage (XLA fast path).
    shape_small = (2, 4, 16, 16)
    x_s = jax.random.normal(kx, shape_small, dtype=jnp.float32)
    y_s = jax.random.normal(ky, shape_small, dtype=jnp.float32)
    _check(x_s, y_s)

    # 2) 4 MiB input, exercises the Pallas path with the >=4-grid-step logic.
    shape_med = (8, 8, 128, 128)
    x_m = jax.random.normal(kx, shape_med, dtype=jnp.float32)
    y_m = jax.random.normal(ky, shape_med, dtype=jnp.float32)
    _check(x_m, y_m)

    # 3) Element count divisible by 128 but not 256/512 and with a ragged
    #    (masked) last grid block -> exercises adaptive lane width + cdiv grid.
    shape_narrow = (12289, 128)
    x_n = jax.random.normal(kx, shape_narrow, dtype=jnp.float32)
    y_n = jax.random.normal(ky, shape_narrow, dtype=jnp.float32)
    _check(x_n, y_n)

    # 4) Larger, fully aligned shape: full 4 MiB blocks, natural grid of 4.
    shape_big = (16, 8, 256, 128)
    x_b = jax.random.normal(kx, shape_big, dtype=jnp.float32)
    y_b = jax.random.normal(ky, shape_big, dtype=jnp.float32)
    _check(x_b, y_b)

    # 5) Awkward shape (element count not a multiple of 128) -> fused-XLA
    #    fallback, which is roofline-optimal without any pad/slice copies.
    shape_odd = (2, 3, 250, 217)
    x_o = jax.random.normal(kx, shape_odd, dtype=jnp.float32)
    y_o = jax.random.normal(ky, shape_odd, dtype=jnp.float32)
    _check(x_o, y_o)

    # 6) Broadcasting (torch.pow(x - y, 2) broadcasts) -> XLA broadcast path.
    y_bcast = jax.random.normal(ky, (1, 4, 1, 16), dtype=jnp.float32)
    _check(x_s, y_bcast)

    print("KERNEL_OK")
</pallas_src>

<mosaic_0001>
module attributes {stable_mosaic.version = 11 : i64} {
  func.func @_sq_diff_kernel(%arg0: i32, %arg1: memref<512x512xf32, #tpu.memory_space<vmem>>, %arg2: memref<512x512xf32, #tpu.memory_space<vmem>>, %arg3: memref<512x512xf32, #tpu.memory_space<vmem>>) attributes {dimension_semantics = [#tpu.dimension_semantics<parallel>], iteration_bounds = array<i64: 4>, scalar_prefetch = 0 : i64, scratch_operands = 0 : i64, tpu.core_type = #tpu.core_type<tc>, window_params = [{transform_indices = @transform_0, window_bounds = array<i64: 512, 512>}, {transform_indices = @transform_1, window_bounds = array<i64: 512, 512>}, {transform_indices = @transform_2, window_bounds = array<i64: 512, 512>}]} {
    %c0 = arith.constant 0 : index
    %c0_0 = arith.constant 0 : index
    %0 = vector.load %arg1[%c0, %c0_0] : memref<512x512xf32, #tpu.memory_space<vmem>>, vector<512x512xf32>
    %c0_1 = arith.constant 0 : index
    %c0_2 = arith.constant 0 : index
    %1 = vector.load %arg2[%c0_1, %c0_2] : memref<512x512xf32, #tpu.memory_space<vmem>>, vector<512x512xf32>
    %2 = arith.subf %0, %1 : vector<512x512xf32>
    %3 = arith.mulf %2, %2 : vector<512x512xf32>
    %c0_3 = arith.constant 0 : index
    %c0_4 = arith.constant 0 : index
    %4 = vector.load %arg3[%c0_3, %c0_4] : memref<512x512xf32, #tpu.memory_space<vmem>>, vector<512x512xf32>
    tpu.vector_store %arg3[%c0_3, %c0_4], %3 {strides = array<i32>} : memref<512x512xf32, #tpu.memory_space<vmem>>, vector<512x512xf32>,
    return
  }
  func.func @transform_0(%arg0: i32) -> (i32, i32) {
    %c0_i32 = arith.constant 0 : i32
    %c0_i32_0 = arith.constant 0 : i32
    return %arg0, %c0_i32 : i32, i32
  }
  func.func @transform_1(%arg0: i32) -> (i32, i32) {
    %c0_i32 = arith.constant 0 : i32
    %c0_i32_0 = arith.constant 0 : i32
    return %arg0, %c0_i32 : i32, i32
  }
  func.func @transform_2(%arg0: i32) -> (i32, i32) {
    %c0_i32 = arith.constant 0 : i32
    %c0_i32_0 = arith.constant 0 : i32
    return %arg0, %c0_i32 : i32, i32
  }
}

</mosaic_0001>

<bundles_post_ra>
// kernel: tpu_custom_call.1
= control target key start
LH: loop header
LB: loop body
LE: loop exit
PB: predicated region body
PF: predicated region fallthrough
CT: control target
= control target key end

     0   :  { %7 = vsyncpa [#allocation3], 0  ;;  %s2783_s0 = inlined_call_operand.hbm [shape: f32[2048,512], index: 0, kind: input, shape index: {}]   ;;  %s2784_s1 = inlined_call_operand.hbm [shape: f32[2048,512], index: 1, kind: input, shape index: {}]   ;;  %s2785_s2 = inlined_call_operand.hbm [shape: f32[2048,512], index: 2, kind: output, shape index: {}]  }
   0x1   :  { %9 = vsyncpa [#allocation3 + $0x1], 0 }
   0x2   :  { %10 = vsyncpa [#allocation6], 0 }
   0x3   :  { %12 = vsyncpa [#allocation6 + $0x1], 0 }
   0x4   :  { %13 = vsyncpa [#allocation4], 0 }
   0x5   :  { %15 = vsyncpa [#allocation4 + $0x1], 0  ;;  %s1837_s9 = smov 0   ;;  %s1839_s10 = smov 0  }
   0x6   :  { %s1841_s11 = smov 0   ;;  %s1843_s12 = smov 0  }
   0x7 LB: > { %s1858_s13 = sadd.s32 4294967295, %s1816_s12   ;;  %s1604_s14 = sadd.s32 4294967294, %s1816_s12   ;;  %s1816_s12 = sphi %s1843_s12, %s2795_s12   ;;  %s1812_s11 = sphi %s1841_s11, %s2794_s11   ;;  %s1808_s10 = sphi %s1839_s10, %s2793_s10   ;;  %s1804_s9 = sphi %s1837_s9, %s2792_s9  }
   0x8   : > { %s1862_s15 = sadd.s32 1, %s1816_s12   ;;  %s28_s16 = sadd.s32 1, %s1812_s11 }
   0x9   : > { %s25_s17 = ssub.s32 %s1816_s12, %s1862_s15  ;;  %p35_p0 = scmp.ne.s32.totalorder %s1812_s11, %s1808_s10 }
   0xa   : > { %p26_p1 = scmp.eq.s32.totalorder %s25_s17, 0  ;;  %p36_p2 = scmp.eq.s32.totalorder %s1816_s12, 0 }
   0xb   : > { %p41_p3 = scmp.ne.s32.totalorder %s1808_s10, %s1804_s9  ;;  %p42_p4 = scmp.eq.s32.totalorder %s1858_s13, 0 }
   0xc   : > { %s1874_s18 = scalar_select %p26_p1, %s1812_s11, %s28_s16  }
   0xd   : > { %p1876_p5 = por %p36_p2, %p35_p0  ;;  %p1880_p6 = por %p42_p4, %p41_p3 }
   0xe   : > { %p91_p7 = scmp.eq.s32.totalorder %s1858_s13, 3  ;;  %p97_p8 = scmp.eq.s32.totalorder %s1604_s14, 3 }
   0xf   : > { %p1648_p9 = scmp.lt.s32.totalorder %s1816_s12, 4  ;;  %s1895_s23 = sand.u32 1, %s1812_s11  }
  0x10   : > { %p1886_p10 = por %p91_p7, %p35_p0  ;;  %p1890_p11 = por %p97_p8, %p41_p3 }
  0x11   : > { %s1626_s24 = sshll.u32 %s1816_s12, 11  ;;  %s1607_s25 = sshll.u32 %s1895_s23, 11 }
  0x12   : > { %s127_s28 = scalar_lea.hbm %s2783_s0, %s1626_s24  ;;  %s121_s30 = scalar_lea.vmem [#allocation2], %s1607_s25 }
  0x13   : > { %s128_s29 = sshll.u32 %s127_s28, 4  ;;  %s130_s3 = sshll.u32 %s121_s30, 4  ;;  %s129_s29 = int_to_ptr.hbm [resolvable:$true] %s128_s29  ;;  %s131_s3 = int_to_ptr.vmem [resolvable:$true] %s130_s3 }
  0x14   : > { %p1908_p12 = pnand %p1648_p9, %p1876_p5  ;;  %p1615_p13 = scmp.ge.s32.totalorder %s1816_s12, 1 }
  0x15   : > { %p161_p0 = scmp.lt.s32.totalorder %s1816_s12, 5  ;;  %s118_s5 = scalar_lea.sflag [#allocation3], %s1895_s23 }
  0x16   : > { %s1686_s6 = sshra.s32 %s129_s29, 4  ;;  %p1690_p2 = pneg %p1908_p12  ;;  %s1687_s6 = int_to_ptr.hbm [resolvable:$true] %s1686_s6 }
  0x17   : > { %s1688_s7 = scalar_lea.hbm %s1687_s6, 2048  ;;  %s1693_s16 = scalar_lea.hbm %s2783_s0, 8192 }
  0x18   : > { %p1689_p1 = scmp.ne.s32.totalorder %s1687_s6, %s1688_s7  ;;  %p1694_p5 = scmp.lt.s32.totalorder %s1687_s6, %s2783_s0 }
  0x19   : > { %p1695_p7 = scmp.lt.s32.totalorder %s1693_s16, %s1688_s7 }
  0x1a   : > { %p1691_p3 = pnand %p1690_p2, %p1689_p1 }
  0x1b   : > { %p1696_p8 = por %p1695_p7, %p1694_p5 }
  0x1c   : > { %p1692_p4 = pneg %p1691_p3 }
  0x1e   : > { %p1697_p9 = pnand %p1696_p8, %p1692_p4 }
  0x20   : > { %1700 = shalt.err (!%p1697_p9)
}
  0x21   : > { %s1818_s26 = smov 512   ;;  %s1819_s27 = smov 32  }
  0x22   : > { %1640 = dma.hbm_to_vmem [thread:$0]  (!%p1908_p12), %s129_s29, 32768, %s131_s3, %s118_s5, %s1818_s26, %s1818_s26, %s1819_s27  }
  0x23   : > { %p1932_p1 = pnand %p1615_p13, %p161_p0  ;;  %s150_s7 = scalar_lea.hbm %s2784_s1, %s1626_s24 }
  0x24   : > { %s151_s8 = sshll.u32 %s150_s7, 4  ;;  %s144_s14 = scalar_lea.vmem [#allocation5], %s1607_s25  ;;  %s152_s8 = int_to_ptr.hbm [resolvable:$true] %s151_s8 }
  0x25   : > { %s153_s16 = sshll.u32 %s144_s14, 4  ;;  %s141_s17 = scalar_lea.sflag [#allocation6], %s1895_s23  ;;  %s154_s16 = int_to_ptr.vmem [resolvable:$true] %s153_s16 }
  0x26   : > { %s1716_s19 = sshra.s32 %s152_s8, 4  ;;  %s1723_s30 = scalar_lea.hbm %s2784_s1, 8192  ;;  %s1717_s19 = int_to_ptr.hbm [resolvable:$true] %s1716_s19 }
  0x27   : > { %s1718_s29 = scalar_lea.hbm %s1717_s19, 2048  ;;  %p1724_p4 = scmp.lt.s32.totalorder %s1717_s19, %s2784_s1 }
  0x28   : > { %p1719_p3 = scmp.ne.s32.totalorder %s1717_s19, %s1718_s29  ;;  %p1725_p5 = scmp.lt.s32.totalorder %s1723_s30, %s1718_s29 }
  0x2a   : > { %p1721_p13 = pnand %p1719_p3, %p1690_p2  ;;  %p1726_p7 = por %p1725_p5, %p1724_p4 }
  0x2c   : > { %p1722_p0 = pneg %p1721_p13 }
  0x2e   : > { %p1727_p8 = pnand %p1726_p7, %p1722_p0 }
  0x30   : > { %1730 = shalt.err (!%p1727_p8)
}
  0x31   : > { %1643 = dma.hbm_to_vmem [thread:$0]  (!%p1908_p12), %s152_s8, 32768, %s154_s16, %s141_s17, %s1818_s26, %s1818_s26, %s1819_s27  }
  0x32   : > { %165 = sbr.rel (%p1932_p1) target bundleno = 323 (0x143), region = 28  ;;  %s1958_s23 = sand.u32 (!%p1932_p1), 1, %s1808_s10  }
  0x33   : > { %s1961_s25 = sshll.u32 (!%p1932_p1), %s1958_s23, 11  ;;  %s168_s7 = scalar_lea.sflag (!%p1932_p1), [#allocation3], %s1958_s23 }
  0x34   : > { %s1965_s14 = scalar_lea.vmem (!%p1932_p1), [#allocation2], %s1961_s25 }
  0x37   : > { %1791 = dma.done.wait (%p1880_p6), %s168_s7, 32768  }
  0x38   : > { %1793 = vsyncadd (%p1880_p6), %s168_s7, 4294934528  ;;  %s178_s4 = scalar_lea.sflag [#allocation6], %s1958_s23  ;;  %s1973_s26 = scalar_lea.vmem [#allocation5], %s1961_s25 }
  0x39   : > { %1795 = dma.done.wait (%p1880_p6), %s178_s4, 32768  }
  0x3a   : > { %1797 = vsyncadd (%p1880_p6), %s178_s4, 4294934528  ;;  %v211_v0 = vld [vmem:[%s1965_s14] sm:$0xff]  ;;  %v212_v2 = vld [vmem:[%s1965_s14 + $0x8] sm:$0xff]  ;;  %s1995_s20 = scalar_lea.vmem [#allocation7], %s1961_s25  ;;  %s1630_s27 = sshll.u32 %s1858_s13, 11 }
  0x3b   : > { %v467_v1 = vld [vmem:[%s1973_s26] sm:$0xff]  ;;  %v468_v4 = vld [vmem:[%s1973_s26 + $0x8] sm:$0xff]  ;;  %v213_v5 = vld [vmem:[%s1965_s14 + $0x10] sm:$0xff]  ;;  %s1504_s13 = scalar_lea.hbm %s2785_s2, %s1630_s27  ;;  %s1505_s16 = sshll.u32 %s1995_s20, 4  ;;  %s1506_s16 = int_to_ptr.vmem [resolvable:$true] %s1505_s16 }
  0x3c   : > { %v723_v3 = vsub.f32 %v211_v0, %v467_v1  ;;  %v469_v6 = vld [vmem:[%s1973_s26 + $0x10] sm:$0xff]  ;;  %v724_v7 = vsub.f32 %v212_v2, %v468_v4  ;;  %v214_v9 = vld [vmem:[%s1965_s14 + $0x18] sm:$0xff]  ;;  %v215_v11 = vld [vmem:[%s1965_s14 + $0x20] sm:$0xff]  ;;  %s1507_s17 = sshll.u32 %s1504_s13, 4  ;;  %s1492_s19 = scalar_lea.sflag [#allocation4], %s1958_s23  ;;  %s1508_s17 = int_to_ptr.hbm [resolvable:$true] %s1507_s17 }
  0x3d   : > { %v725_v8 = vsub.f32 %v213_v5, %v469_v6  ;;  %v470_v10 = vld [vmem:[%s1973_s26 + $0x18] sm:$0xff]  ;;  %v471_v14 = vld [vmem:[%s1973_s26 + $0x20] sm:$0xff]  ;;  %v216_v15 = vld [vmem:[%s1965_s14 + $0x28] sm:$0xff]  ;;  %s1760_s29 = sshra.s32 %s1508_s17, 4  ;;  %s1766_s24 = scalar_lea.hbm %s2785_s2, 8192  ;;  %s1761_s29 = int_to_ptr.hbm [resolvable:$true] %s1760_s29 }
  0x3e   : > { %v979_v12 = vmul.f32 %v723_v3, %v723_v3  ;;  %v726_v13 = vsub.f32 %v214_v9, %v470_v10  ;;  %v472_v16 = vld [vmem:[%s1973_s26 + $0x28] sm:$0xff]  ;;  %v980_v17 = vmul.f32 %v724_v7, %v724_v7  ;;  %v727_v19 = vsub.f32 %v215_v11, %v471_v14  ;;  %v217_v21 = vld [vmem:[%s1965_s14 + $0x30] sm:$0xff]  ;;  %v218_v23 = vld [vmem:[%s1965_s14 + $0x38] sm:$0xff]  ;;  %s1762_s3 = scalar_lea.hbm %s1761_s29, 2048  ;;  %p1767_p9 = scmp.lt.s32.totalorder %s1761_s29, %s2785_s2 }
  0x3f   : > { %v981_v18 = vmul.f32 %v725_v8, %v725_v8  ;;  %v728_v20 = vsub.f32 %v216_v15, %v472_v16  ;;  %v473_v22 = vld [vmem:[%s1973_s26 + $0x30] sm:$0xff]  ;;  %v474_v26 = vld [vmem:[%s1973_s26 + $0x38] sm:$0xff]  ;;  %v219_v27 = vld [vmem:[%s1965_s14 + $0x40] sm:$0xff]  ;;  %p1763_p6 = scmp.ne.s32.totalorder %s1761_s29, %s1762_s3  ;;  %p1768_p1 = scmp.lt.s32.totalorder %s1766_s24, %s1762_s3 }
  0x40   : > { %1235 = vst [vmem:[%s1995_s20] sm:$0xff] %v979_v12  ;;  %v982_v24 = vmul.f32 %v726_v13, %v726_v13  ;;  %v729_v25 = vsub.f32 %v217_v21, %v473_v22  ;;  %v475_v28 = vld [vmem:[%s1973_s26 + $0x40] sm:$0xff]  ;;  %v983_v29 = vmul.f32 %v727_v19, %v727_v19  ;;  %v730_v31 = vsub.f32 %v218_v23, %v474_v26  ;;  %v220_v33 = vld [vmem:[%s1965_s14 + $0x48] sm:$0xff]  ;;  %v221_v35 = vld [vmem:[%s1965_s14 + $0x50] sm:$0xff] }
  0x41   : > { %1236 = vst [vmem:[%s1995_s20 + $0x8] sm:$0xff] %v980_v17  ;;  %v984_v30 = vmul.f32 %v728_v20, %v728_v20  ;;  %v731_v32 = vsub.f32 %v219_v27, %v475_v28  ;;  %v476_v34 = vld [vmem:[%s1973_s26 + $0x48] sm:$0xff]  ;;  %v477_v38 = vld [vmem:[%s1973_s26 + $0x50] sm:$0xff]  ;;  %v222_v39 = vld [vmem:[%s1965_s14 + $0x58] sm:$0xff]  ;;  %p1764_p12 = pnand %p1763_p6, %p1886_p10  ;;  %p1769_p3 = por %p1768_p1, %p1767_p9 }
  0x42   : > { %1237 = vst [vmem:[%s1995_s20 + $0x10] sm:$0xff] %v981_v18  ;;  %v985_v36 = vmul.f32 %v729_v25, %v729_v25  ;;  %v732_v37 = vsub.f32 %v220_v33, %v476_v34  ;;  %v478_v40 = vld [vmem:[%s1973_s26 + $0x58] sm:$0xff]  ;;  %v986_v41 = vmul.f32 %v730_v31, %v730_v31  ;;  %v733_v42 = vsub.f32 %v221_v35, %v477_v38  ;;  %v223_v44 = vld [vmem:[%s1965_s14 + $0x60] sm:$0xff]  ;;  %v224_v46 = vld [vmem:[%s1965_s14 + $0x68] sm:$0xff] }
  0x43   : > { %1238 = vst [vmem:[%s1995_s20 + $0x18] sm:$0xff] %v982_v24  ;;  %v734_v43 = vsub.f32 %v222_v39, %v478_v40  ;;  %v479_v45 = vld [vmem:[%s1973_s26 + $0x60] sm:$0xff]  ;;  %v987_v47 = vmul.f32 %v731_v32, %v731_v32  ;;  %v480_v49 = vld [vmem:[%s1973_s26 + $0x68] sm:$0xff]  ;;  %v225_v50 = vld [vmem:[%s1965_s14 + $0x70] sm:$0xff]  ;;  %p1765_p2 = pneg %p1764_p12 }
  0x44   : > { %1239 = vst [vmem:[%s1995_s20 + $0x20] sm:$0xff] %v983_v29  ;;  %v735_v48 = vsub.f32 %v223_v44, %v479_v45  ;;  %v481_v51 = vld [vmem:[%s1973_s26 + $0x70] sm:$0xff]  ;;  %v988_v52 = vmul.f32 %v732_v37, %v732_v37  ;;  %v736_v53 = vsub.f32 %v224_v46, %v480_v49  ;;  %v226_v54 = vld [vmem:[%s1965_s14 + $0x78] sm:$0xff]  ;;  %v227_v56 = vld [vmem:[%s1965_s14 + $0x80] sm:$0xff]  ;;  %v989_v57 = vmul.f32 %v733_v42, %v733_v42 }
  0x45   : > { %1240 = vst [vmem:[%s1995_s20 + $0x28] sm:$0xff] %v984_v30  ;;  %v482_v55 = vld [vmem:[%s1973_s26 + $0x78] sm:$0xff]  ;;  %v737_v58 = vsub.f32 %v225_v50, %v481_v51  ;;  %v483_v59 = vld [vmem:[%s1973_s26 + $0x80] sm:$0xff]  ;;  %v228_v60 = vld [vmem:[%s1965_s14 + $0x88] sm:$0xff]  ;;  %v990_v62 = vmul.f32 %v734_v43, %v734_v43  ;;  %p1770_p13 = pnand %p1769_p3, %p1765_p2 }
  0x46   : > { %1241 = vst [vmem:[%s1995_s20 + $0x30] sm:$0xff] %v985_v36  ;;  %v484_v61 = vld [vmem:[%s1973_s26 + $0x88] sm:$0xff]  ;;  %v738_v63 = vsub.f32 %v226_v54, %v482_v55  ;;  %v229_v0 = vld [vmem:[%s1965_s14 + $0x90] sm:$0xff]  ;;  %v991_v2 = vmul.f32 %v735_v48, %v735_v48  ;;  %v739_v3 = vsub.f32 %v227_v56, %v483_v59  ;;  %v230_v4 = vld [vmem:[%s1965_s14 + $0x98] sm:$0xff]  ;;  %v992_v6 = vmul.f32 %v736_v53, %v736_v53 }
  0x47   : > { %1242 = vst [vmem:[%s1995_s20 + $0x38] sm:$0xff] %v986_v41  ;;  %v485_v1 = vld [vmem:[%s1973_s26 + $0x90] sm:$0xff]  ;;  %v486_v5 = vld [vmem:[%s1973_s26 + $0x98] sm:$0xff]  ;;  %v740_v7 = vsub.f32 %v228_v60, %v484_v61  ;;  %v231_v8 = vld [vmem:[%s1965_s14 + $0xa0] sm:$0xff]  ;;  %v993_v10 = vmul.f32 %v737_v58, %v737_v58 }
  0x48   : > { %1243 = vst [vmem:[%s1995_s20 + $0x40] sm:$0xff] %v987_v47  ;;  %v487_v9 = vld [vmem:[%s1973_s26 + $0xa0] sm:$0xff]  ;;  %v741_v11 = vsub.f32 %v229_v0, %v485_v1  ;;  %v232_v12 = vld [vmem:[%s1965_s14 + $0xa8] sm:$0xff]  ;;  %v994_v14 = vmul.f32 %v738_v63, %v738_v63  ;;  %v742_v15 = vsub.f32 %v230_v4, %v486_v5  ;;  %v233_v16 = vld [vmem:[%s1965_s14 + $0xb0] sm:$0xff]  ;;  %v995_v18 = vmul.f32 %v739_v3, %v739_v3 }
  0x49   : > { %1244 = vst [vmem:[%s1995_s20 + $0x48] sm:$0xff] %v988_v52  ;;  %v488_v13 = vld [vmem:[%s1973_s26 + $0xa8] sm:$0xff]  ;;  %v489_v17 = vld [vmem:[%s1973_s26 + $0xb0] sm:$0xff]  ;;  %v743_v19 = vsub.f32 %v231_v8, %v487_v9  ;;  %v234_v20 = vld [vmem:[%s1965_s14 + $0xb8] sm:$0xff]  ;;  %v996_v22 = vmul.f32 %v740_v7, %v740_v7 }
  0x4a   : > { %1245 = vst [vmem:[%s1995_s20 + $0x50] sm:$0xff] %v989_v57  ;;  %v490_v21 = vld [vmem:[%s1973_s26 + $0xb8] sm:$0xff]  ;;  %v744_v23 = vsub.f32 %v232_v12, %v488_v13  ;;  %v235_v24 = vld [vmem:[%s1965_s14 + $0xc0] sm:$0xff]  ;;  %v997_v26 = vmul.f32 %v741_v11, %v741_v11  ;;  %v745_v27 = vsub.f32 %v233_v16, %v489_v17  ;;  %v236_v28 = vld [vmem:[%s1965_s14 + $0xc8] sm:$0xff]  ;;  %v998_v30 = vmul.f32 %v742_v15, %v742_v15 }
  0x4b   : > { %1246 = vst [vmem:[%s1995_s20 + $0x58] sm:$0xff] %v990_v62  ;;  %v491_v25 = vld [vmem:[%s1973_s26 + $0xc0] sm:$0xff]  ;;  %v492_v29 = vld [vmem:[%s1973_s26 + $0xc8] sm:$0xff]  ;;  %v746_v31 = vsub.f32 %v234_v20, %v490_v21  ;;  %v237_v32 = vld [vmem:[%s1965_s14 + $0xd0] sm:$0xff]  ;;  %v999_v34 = vmul.f32 %v743_v19, %v743_v19 }
  0x4c   : > { %1247 = vst [vmem:[%s1995_s20 + $0x60] sm:$0xff] %v991_v2  ;;  %v493_v33 = vld [vmem:[%s1973_s26 + $0xd0] sm:$0xff]  ;;  %v747_v35 = vsub.f32 %v235_v24, %v491_v25  ;;  %v238_v36 = vld [vmem:[%s1965_s14 + $0xd8] sm:$0xff]  ;;  %v1000_v38 = vmul.f32 %v744_v23, %v744_v23  ;;  %v748_v39 = vsub.f32 %v236_v28, %v492_v29  ;;  %v239_v40 = vld [vmem:[%s1965_s14 + $0xe0] sm:$0xff]  ;;  %v1001_v42 = vmul.f32 %v745_v27, %v745_v27 }
  0x4d   : > { %1248 = vst [vmem:[%s1995_s20 + $0x68] sm:$0xff] %v992_v6  ;;  %v494_v37 = vld [vmem:[%s1973_s26 + $0xd8] sm:$0xff]  ;;  %v495_v41 = vld [vmem:[%s1973_s26 + $0xe0] sm:$0xff]  ;;  %v749_v43 = vsub.f32 %v237_v32, %v493_v33  ;;  %v240_v44 = vld [vmem:[%s1965_s14 + $0xe8] sm:$0xff]  ;;  %v1002_v46 = vmul.f32 %v746_v31, %v746_v31 }
  0x4e   : > { %1249 = vst [vmem:[%s1995_s20 + $0x70] sm:$0xff] %v993_v10  ;;  %v496_v45 = vld [vmem:[%s1973_s26 + $0xe8] sm:$0xff]  ;;  %v750_v47 = vsub.f32 %v238_v36, %v494_v37  ;;  %v241_v48 = vld [vmem:[%s1965_s14 + $0xf0] sm:$0xff]  ;;  %v1003_v50 = vmul.f32 %v747_v35, %v747_v35  ;;  %v751_v51 = vsub.f32 %v239_v40, %v495_v41  ;;  %v242_v52 = vld [vmem:[%s1965_s14 + $0xf8] sm:$0xff]  ;;  %v1004_v54 = vmul.f32 %v748_v39, %v748_v39 }
  0x4f   : > { %1250 = vst [vmem:[%s1995_s20 + $0x78] sm:$0xff] %v994_v14  ;;  %v497_v49 = vld [vmem:[%s1973_s26 + $0xf0] sm:$0xff]  ;;  %v498_v53 = vld [vmem:[%s1973_s26 + $0xf8] sm:$0xff]  ;;  %v752_v55 = vsub.f32 %v240_v44, %v496_v45  ;;  %v243_v56 = vld [vmem:[%s1965_s14 + $0x100] sm:$0xff]  ;;  %v1005_v58 = vmul.f32 %v749_v43, %v749_v43 }
  0x50   : > { %1251 = vst [vmem:[%s1995_s20 + $0x80] sm:$0xff] %v995_v18  ;;  %v499_v57 = vld [vmem:[%s1973_s26 + $0x100] sm:$0xff]  ;;  %v753_v59 = vsub.f32 %v241_v48, %v497_v49  ;;  %v244_v60 = vld [vmem:[%s1965_s14 + $0x108] sm:$0xff]  ;;  %v1006_v62 = vmul.f32 %v750_v47, %v750_v47  ;;  %v754_v63 = vsub.f32 %v242_v52, %v498_v53  ;;  %v245_v0 = vld [vmem:[%s1965_s14 + $0x110] sm:$0xff]  ;;  %v1007_v2 = vmul.f32 %v751_v51, %v751_v51 }
  0x51   : > { %1252 = vst [vmem:[%s1995_s20 + $0x88] sm:$0xff] %v996_v22  ;;  %v500_v61 = vld [vmem:[%s1973_s26 + $0x108] sm:$0xff]  ;;  %v501_v1 = vld [vmem:[%s1973_s26 + $0x110] sm:$0xff]  ;;  %v755_v3 = vsub.f32 %v243_v56, %v499_v57  ;;  %v246_v4 = vld [vmem:[%s1965_s14 + $0x118] sm:$0xff]  ;;  %v1008_v6 = vmul.f32 %v752_v55, %v752_v55 }
  0x52   : > { %1253 = vst [vmem:[%s1995_s20 + $0x90] sm:$0xff] %v997_v26  ;;  %v502_v5 = vld [vmem:[%s1973_s26 + $0x118] sm:$0xff]  ;;  %v756_v7 = vsub.f32 %v244_v60, %v500_v61  ;;  %v247_v8 = vld [vmem:[%s1965_s14 + $0x120] sm:$0xff]  ;;  %v1009_v10 = vmul.f32 %v753_v59, %v753_v59  ;;  %v757_v11 = vsub.f32 %v245_v0, %v501_v1  ;;  %v248_v12 = vld [vmem:[%s1965_s14 + $0x128] sm:$0xff]  ;;  %v1010_v14 = vmul.f32 %v754_v63, %v754_v63 }
  0x53   : > { %1254 = vst [vmem:[%s1995_s20 + $0x98] sm:$0xff] %v998_v30  ;;  %v503_v9 = vld [vmem:[%s1973_s26 + $0x120] sm:$0xff]  ;;  %v504_v13 = vld [vmem:[%s1973_s26 + $0x128] sm:$0xff]  ;;  %v758_v15 = vsub.f32 %v246_v4, %v502_v5  ;;  %v249_v16 = vld [vmem:[%s1965_s14 + $0x130] sm:$0xff]  ;;  %v1011_v18 = vmul.f32 %v755_v3, %v755_v3 }
  0x54   : > { %1255 = vst [vmem:[%s1995_s20 + $0xa0] sm:$0xff] %v999_v34  ;;  %v505_v17 = vld [vmem:[%s1973_s26 + $0x130] sm:$0xff]  ;;  %v759_v19 = vsub.f32 %v247_v8, %v503_v9  ;;  %v250_v20 = vld [vmem:[%s1965_s14 + $0x138] sm:$0xff]  ;;  %v1012_v22 = vmul.f32 %v756_v7, %v756_v7  ;;  %v760_v23 = vsub.f32 %v248_v12, %v504_v13  ;;  %v251_v24 = vld [vmem:[%s1965_s14 + $0x140] sm:$0xff]  ;;  %v1013_v26 = vmul.f32 %v757_v11, %v757_v11 }
  0x55   : > { %1256 = vst [vmem:[%s1995_s20 + $0xa8] sm:$0xff] %v1000_v38  ;;  %v506_v21 = vld [vmem:[%s1973_s26 + $0x138] sm:$0xff]  ;;  %v507_v25 = vld [vmem:[%s1973_s26 + $0x140] sm:$0xff]  ;;  %v761_v27 = vsub.f32 %v249_v16, %v505_v17  ;;  %v252_v28 = vld [vmem:[%s1965_s14 + $0x148] sm:$0xff]  ;;  %v1014_v30 = vmul.f32 %v758_v15, %v758_v15 }
  0x56   : > { %1257 = vst [vmem:[%s1995_s20 + $0xb0] sm:$0xff] %v1001_v42  ;;  %v508_v29 = vld [vmem:[%s1973_s26 + $0x148] sm:$0xff]  ;;  %v762_v31 = vsub.f32 %v250_v20, %v506_v21  ;;  %v253_v32 = vld [vmem:[%s1965_s14 + $0x150] sm:$0xff]  ;;  %v1015_v34 = vmul.f32 %v759_v19, %v759_v19  ;;  %v763_v35 = vsub.f32 %v251_v24, %v507_v25  ;;  %v254_v36 = vld [vmem:[%s1965_s14 + $0x158] sm:$0xff]  ;;  %v1016_v38 = vmul.f32 %v760_v23, %v760_v23 }
  0x57   : > { %1258 = vst [vmem:[%s1995_s20 + $0xb8] sm:$0xff] %v1002_v46  ;;  %v509_v33 = vld [vmem:[%s1973_s26 + $0x150] sm:$0xff]  ;;  %v510_v37 = vld [vmem:[%s1973_s26 + $0x158] sm:$0xff]  ;;  %v764_v39 = vsub.f32 %v252_v28, %v508_v29  ;;  %v255_v40 = vld [vmem:[%s1965_s14 + $0x160] sm:$0xff]  ;;  %v1017_v42 = vmul.f32 %v761_v27, %v761_v27 }
  0x58   : > { %1259 = vst [vmem:[%s1995_s20 + $0xc0] sm:$0xff] %v1003_v50  ;;  %v511_v41 = vld [vmem:[%s1973_s26 + $0x160] sm:$0xff]  ;;  %v765_v43 = vsub.f32 %v253_v32, %v509_v33  ;;  %v256_v44 = vld [vmem:[%s1965_s14 + $0x168] sm:$0xff]  ;;  %v1018_v46 = vmul.f32 %v762_v31, %v762_v31  ;;  %v766_v47 = vsub.f32 %v254_v36, %v510_v37  ;;  %v257_v48 = vld [vmem:[%s1965_s14 + $0x170] sm:$0xff]  ;;  %v1019_v50 = vmul.f32 %v763_v35, %v763_v35 }
  0x59   : > { %1260 = vst [vmem:[%s1995_s20 + $0xc8] sm:$0xff] %v1004_v54  ;;  %v512_v45 = vld [vmem:[%s1973_s26 + $0x168] sm:$0xff]  ;;  %v513_v49 = vld [vmem:[%s1973_s26 + $0x170] sm:$0xff]  ;;  %v767_v51 = vsub.f32 %v255_v40, %v511_v41  ;;  %v258_v52 = vld [vmem:[%s1965_s14 + $0x178] sm:$0xff]  ;;  %v1020_v54 = vmul.f32 %v764_v39, %v764_v39 }
  0x5a   : > { %1261 = vst [vmem:[%s1995_s20 + $0xd0] sm:$0xff] %v1005_v58  ;;  %v514_v53 = vld [vmem:[%s1973_s26 + $0x178] sm:$0xff]  ;;  %v768_v55 = vsub.f32 %v256_v44, %v512_v45  ;;  %v259_v56 = vld [vmem:[%s1965_s14 + $0x180] sm:$0xff]  ;;  %v1021_v58 = vmul.f32 %v765_v43, %v765_v43  ;;  %v769_v59 = vsub.f32 %v257_v48, %v513_v49  ;;  %v260_v60 = vld [vmem:[%s1965_s14 + $0x188] sm:$0xff] }
  0x5b   : > { %1262 = vst [vmem:[%s1995_s20 + $0xd8] sm:$0xff] %v1006_v62  ;;  %v515_v57 = vld [vmem:[%s1973_s26 + $0x180] sm:$0xff]  ;;  %v516_v61 = vld [vmem:[%s1973_s26 + $0x188] sm:$0xff]  ;;  %v1022_v62 = vmul.f32 %v766_v47, %v766_v47  ;;  %v770_v63 = vsub.f32 %v258_v52, %v514_v53  ;;  %v261_v0 = vld [vmem:[%s1965_s14 + $0x190] sm:$0xff] }
  0x5c   : > { %1263 = vst [vmem:[%s1995_s20 + $0xe0] sm:$0xff] %v1007_v2  ;;  %v517_v1 = vld [vmem:[%s1973_s26 + $0x190] sm:$0xff]  ;;  %v1023_v2 = vmul.f32 %v767_v51, %v767_v51  ;;  %v771_v3 = vsub.f32 %v259_v56, %v515_v57  ;;  %v262_v4 = vld [vmem:[%s1965_s14 + $0x198] sm:$0xff]  ;;  %v772_v7 = vsub.f32 %v260_v60, %v516_v61  ;;  %v263_v8 = vld [vmem:[%s1965_s14 + $0x1a0] sm:$0xff] }
  0x5d   : > { %1264 = vst [vmem:[%s1995_s20 + $0xe8] sm:$0xff] %v1008_v6  ;;  %v518_v5 = vld [vmem:[%s1973_s26 + $0x198] sm:$0xff]  ;;  %v1024_v6 = vmul.f32 %v768_v55, %v768_v55  ;;  %v519_v9 = vld [vmem:[%s1973_s26 + $0x1a0] sm:$0xff]  ;;  %v773_v11 = vsub.f32 %v261_v0, %v517_v1  ;;  %v264_v12 = vld [vmem:[%s1965_s14 + $0x1a8] sm:$0xff] }
  0x5e   : > { %1265 = vst [vmem:[%s1995_s20 + $0xf0] sm:$0xff] %v1009_v10  ;;  %v1025_v10 = vmul.f32 %v769_v59, %v769_v59  ;;  %v520_v13 = vld [vmem:[%s1973_s26 + $0x1a8] sm:$0xff]  ;;  %v774_v15 = vsub.f32 %v262_v4, %v518_v5  ;;  %v265_v16 = vld [vmem:[%s1965_s14 + $0x1b0] sm:$0xff]  ;;  %v775_v19 = vsub.f32 %v263_v8, %v519_v9  ;;  %v266_v20 = vld [vmem:[%s1965_s14 + $0x1b8] sm:$0xff] }
  0x5f   : > { %1266 = vst [vmem:[%s1995_s20 + $0xf8] sm:$0xff] %v1010_v14  ;;  %v1026_v14 = vmul.f32 %v770_v63, %v770_v63  ;;  %v521_v17 = vld [vmem:[%s1973_s26 + $0x1b0] sm:$0xff]  ;;  %v522_v21 = vld [vmem:[%s1973_s26 + $0x1b8] sm:$0xff]  ;;  %v776_v23 = vsub.f32 %v264_v12, %v520_v13  ;;  %v267_v24 = vld [vmem:[%s1965_s14 + $0x1c0] sm:$0xff] }
  0x60   : > { %1267 = vst [vmem:[%s1995_s20 + $0x100] sm:$0xff] %v1011_v18  ;;  %v1027_v18 = vmul.f32 %v771_v3, %v771_v3  ;;  %v523_v25 = vld [vmem:[%s1973_s26 + $0x1c0] sm:$0xff]  ;;  %v777_v27 = vsub.f32 %v265_v16, %v521_v17  ;;  %v268_v28 = vld [vmem:[%s1965_s14 + $0x1c8] sm:$0xff]  ;;  %v778_v31 = vsub.f32 %v266_v20, %v522_v21  ;;  %v269_v32 = vld [vmem:[%s1965_s14 + $0x1d0] sm:$0xff] }
  0x61   : > { %1268 = vst [vmem:[%s1995_s20 + $0x108] sm:$0xff] %v1012_v22  ;;  %v1028_v22 = vmul.f32 %v772_v7, %v772_v7  ;;  %v524_v29 = vld [vmem:[%s1973_s26 + $0x1c8] sm:$0xff]  ;;  %v525_v33 = vld [vmem:[%s1973_s26 + $0x1d0] sm:$0xff]  ;;  %v779_v35 = vsub.f32 %v267_v24, %v523_v25  ;;  %v270_v36 = vld [vmem:[%s1965_s14 + $0x1d8] sm:$0xff] }
  0x62   : > { %1269 = vst [vmem:[%s1995_s20 + $0x110] sm:$0xff] %v1013_v26  ;;  %v1029_v26 = vmul.f32 %v773_v11, %v773_v11  ;;  %v526_v37 = vld [vmem:[%s1973_s26 + $0x1d8] sm:$0xff]  ;;  %v780_v39 = vsub.f32 %v268_v28, %v524_v29  ;;  %v271_v40 = vld [vmem:[%s1965_s14 + $0x1e0] sm:$0xff]  ;;  %v781_v43 = vsub.f32 %v269_v32, %v525_v33  ;;  %v272_v44 = vld [vmem:[%s1965_s14 + $0x1e8] sm:$0xff] }
  0x63   : > { %1270 = vst [vmem:[%s1995_s20 + $0x118] sm:$0xff] %v1014_v30  ;;  %v1030_v30 = vmul.f32 %v774_v15, %v774_v15  ;;  %v527_v41 = vld [vmem:[%s1973_s26 + $0x1e0] sm:$0xff]  ;;  %v528_v45 = vld [vmem:[%s1973_s26 + $0x1e8] sm:$0xff]  ;;  %v782_v47 = vsub.f32 %v270_v36, %v526_v37  ;;  %v273_v48 = vld [vmem:[%s1965_s14 + $0x1f0] sm:$0xff] }
  0x64   : > { %1271 = vst [vmem:[%s1995_s20 + $0x120] sm:$0xff] %v1015_v34  ;;  %v1031_v34 = vmul.f32 %v775_v19, %v775_v19  ;;  %v529_v49 = vld [vmem:[%s1973_s26 + $0x1f0] sm:$0xff]  ;;  %v783_v51 = vsub.f32 %v271_v40, %v527_v41  ;;  %v274_v52 = vld [vmem:[%s1965_s14 + $0x1f8] sm:$0xff]  ;;  %v784_v55 = vsub.f32 %v272_v44, %v528_v45  ;;  %v275_v56 = vld [vmem:[%s1965_s14 + $0x200] sm:$0xff] }
  0x65   : > { %1272 = vst [vmem:[%s1995_s20 + $0x128] sm:$0xff] %v1016_v38  ;;  %v1032_v38 = vmul.f32 %v776_v23, %v776_v23  ;;  %v530_v53 = vld [vmem:[%s1973_s26 + $0x1f8] sm:$0xff]  ;;  %v531_v57 = vld [vmem:[%s1973_s26 + $0x200] sm:$0xff]  ;;  %v785_v59 = vsub.f32 %v273_v48, %v529_v49  ;;  %v276_v60 = vld [vmem:[%s1965_s14 + $0x208] sm:$0xff] }
  0x66   : > { %1273 = vst [vmem:[%s1995_s20 + $0x130] sm:$0xff] %v1017_v42  ;;  %v1033_v42 = vmul.f32 %v777_v27, %v777_v27  ;;  %v532_v61 = vld [vmem:[%s1973_s26 + $0x208] sm:$0xff]  ;;  %v786_v63 = vsub.f32 %v274_v52, %v530_v53  ;;  %v277_v0 = vld [vmem:[%s1965_s14 + $0x210] sm:$0xff]  ;;  %v787_v3 = vsub.f32 %v275_v56, %v531_v57  ;;  %v278_v4 = vld [vmem:[%s1965_s14 + $0x218] sm:$0xff] }
  0x67   : > { %1274 = vst [vmem:[%s1995_s20 + $0x138] sm:$0xff] %v1018_v46  ;;  %v1034_v46 = vmul.f32 %v778_v31, %v778_v31  ;;  %v533_v1 = vld [vmem:[%s1973_s26 + $0x210] sm:$0xff]  ;;  %v534_v5 = vld [vmem:[%s1973_s26 + $0x218] sm:$0xff]  ;;  %v788_v7 = vsub.f32 %v276_v60, %v532_v61  ;;  %v279_v8 = vld [vmem:[%s1965_s14 + $0x220] sm:$0xff] }
  0x68   : > { %1275 = vst [vmem:[%s1995_s20 + $0x140] sm:$0xff] %v1019_v50  ;;  %v1035_v50 = vmul.f32 %v779_v35, %v779_v35  ;;  %v535_v9 = vld [vmem:[%s1973_s26 + $0x220] sm:$0xff]  ;;  %v789_v11 = vsub.f32 %v277_v0, %v533_v1  ;;  %v280_v12 = vld [vmem:[%s1965_s14 + $0x228] sm:$0xff]  ;;  %v790_v15 = vsub.f32 %v278_v4, %v534_v5  ;;  %v281_v16 = vld [vmem:[%s1965_s14 + $0x230] sm:$0xff] }
  0x69   : > { %1276 = vst [vmem:[%s1995_s20 + $0x148] sm:$0xff] %v1020_v54  ;;  %v1036_v54 = vmul.f32 %v780_v39, %v780_v39  ;;  %v536_v13 = vld [vmem:[%s1973_s26 + $0x228] sm:$0xff]  ;;  %v537_v17 = vld [vmem:[%s1973_s26 + $0x230] sm:$0xff]  ;;  %v791_v19 = vsub.f32 %v279_v8, %v535_v9  ;;  %v282_v20 = vld [vmem:[%s1965_s14 + $0x238] sm:$0xff] }
  0x6a   : > { %1277 = vst [vmem:[%s1995_s20 + $0x150] sm:$0xff] %v1021_v58  ;;  %v1037_v58 = vmul.f32 %v781_v43, %v781_v43  ;;  %v538_v21 = vld [vmem:[%s1973_s26 + $0x238] sm:$0xff]  ;;  %v792_v23 = vsub.f32 %v280_v12, %v536_v13  ;;  %v283_v24 = vld [vmem:[%s1965_s14 + $0x240] sm:$0xff]  ;;  %v793_v27 = vsub.f32 %v281_v16, %v537_v17  ;;  %v284_v28 = vld [vmem:[%s1965_s14 + $0x248] sm:$0xff] }
  0x6b   : > { %1278 = vst [vmem:[%s1995_s20 + $0x158] sm:$0xff] %v1022_v62  ;;  %v1038_v62 = vmul.f32 %v782_v47, %v782_v47  ;;  %v539_v25 = vld [vmem:[%s1973_s26 + $0x240] sm:$0xff]  ;;  %v540_v29 = vld [vmem:[%s1973_s26 + $0x248] sm:$0xff]  ;;  %v794_v31 = vsub.f32 %v282_v20, %v538_v21  ;;  %v285_v32 = vld [vmem:[%s1965_s14 + $0x250] sm:$0xff] }
  0x6c   : > { %1279 = vst [vmem:[%s1995_s20 + $0x160] sm:$0xff] %v1023_v2  ;;  %v1039_v2 = vmul.f32 %v783_v51, %v783_v51  ;;  %v541_v33 = vld [vmem:[%s1973_s26 + $0x250] sm:$0xff]  ;;  %v795_v35 = vsub.f32 %v283_v24, %v539_v25  ;;  %v286_v36 = vld [vmem:[%s1965_s14 + $0x258] sm:$0xff]  ;;  %v796_v39 = vsub.f32 %v284_v28, %v540_v29  ;;  %v287_v40 = vld [vmem:[%s1965_s14 + $0x260] sm:$0xff] }
  0x6d   : > { %1280 = vst [vmem:[%s1995_s20 + $0x168] sm:$0xff] %v1024_v6  ;;  %v1040_v6 = vmul.f32 %v784_v55, %v784_v55  ;;  %v542_v37 = vld [vmem:[%s1973_s26 + $0x258] sm:$0xff]  ;;  %v543_v41 = vld [vmem:[%s1973_s26 + $0x260] sm:$0xff]  ;;  %v797_v43 = vsub.f32 %v285_v32, %v541_v33  ;;  %v288_v44 = vld [vmem:[%s1965_s14 + $0x268] sm:$0xff] }
  0x6e   : > { %1281 = vst [vmem:[%s1995_s20 + $0x170] sm:$0xff] %v1025_v10  ;;  %v1041_v10 = vmul.f32 %v785_v59, %v785_v59  ;;  %v544_v45 = vld [vmem:[%s1973_s26 + $0x268] sm:$0xff]  ;;  %v798_v47 = vsub.f32 %v286_v36, %v542_v37  ;;  %v289_v48 = vld [vmem:[%s1965_s14 + $0x270] sm:$0xff]  ;;  %v799_v51 = vsub.f32 %v287_v40, %v543_v41  ;;  %v290_v52 = vld [vmem:[%s1965_s14 + $0x278] sm:$0xff] }
  0x6f   : > { %1282 = vst [vmem:[%s1995_s20 + $0x178] sm:$0xff] %v1026_v14  ;;  %v1042_v14 = vmul.f32 %v786_v63, %v786_v63  ;;  %v545_v49 = vld [vmem:[%s1973_s26 + $0x270] sm:$0xff]  ;;  %v546_v53 = vld [vmem:[%s1973_s26 + $0x278] sm:$0xff]  ;;  %v800_v55 = vsub.f32 %v288_v44, %v544_v45  ;;  %v291_v56 = vld [vmem:[%s1965_s14 + $0x280] sm:$0xff] }
  0x70   : > { %1283 = vst [vmem:[%s1995_s20 + $0x180] sm:$0xff] %v1027_v18  ;;  %v1043_v18 = vmul.f32 %v787_v3, %v787_v3  ;;  %v547_v57 = vld [vmem:[%s1973_s26 + $0x280] sm:$0xff]  ;;  %v801_v59 = vsub.f32 %v289_v48, %v545_v49  ;;  %v292_v60 = vld [vmem:[%s1965_s14 + $0x288] sm:$0xff]  ;;  %v802_v63 = vsub.f32 %v290_v52, %v546_v53  ;;  %v293_v0 = vld [vmem:[%s1965_s14 + $0x290] sm:$0xff] }
  0x71   : > { %1284 = vst [vmem:[%s1995_s20 + $0x188] sm:$0xff] %v1028_v22  ;;  %v1044_v22 = vmul.f32 %v788_v7, %v788_v7  ;;  %v548_v61 = vld [vmem:[%s1973_s26 + $0x288] sm:$0xff]  ;;  %v549_v1 = vld [vmem:[%s1973_s26 + $0x290] sm:$0xff]  ;;  %v803_v3 = vsub.f32 %v291_v56, %v547_v57  ;;  %v294_v4 = vld [vmem:[%s1965_s14 + $0x298] sm:$0xff] }
  0x72   : > { %1285 = vst [vmem:[%s1995_s20 + $0x190] sm:$0xff] %v1029_v26  ;;  %v1045_v26 = vmul.f32 %v789_v11, %v789_v11  ;;  %v550_v5 = vld [vmem:[%s1973_s26 + $0x298] sm:$0xff]  ;;  %v804_v7 = vsub.f32 %v292_v60, %v548_v61  ;;  %v295_v8 = vld [vmem:[%s1965_s14 + $0x2a0] sm:$0xff]  ;;  %v805_v11 = vsub.f32 %v293_v0, %v549_v1  ;;  %v296_v12 = vld [vmem:[%s1965_s14 + $0x2a8] sm:$0xff] }
  0x73   : > { %1286 = vst [vmem:[%s1995_s20 + $0x198] sm:$0xff] %v1030_v30  ;;  %v1046_v30 = vmul.f32 %v790_v15, %v790_v15  ;;  %v551_v9 = vld [vmem:[%s1973_s26 + $0x2a0] sm:$0xff]  ;;  %v552_v13 = vld [vmem:[%s1973_s26 + $0x2a8] sm:$0xff]  ;;  %v806_v15 = vsub.f32 %v294_v4, %v550_v5  ;;  %v297_v16 = vld [vmem:[%s1965_s14 + $0x2b0] sm:$0xff] }
  0x74   : > { %1287 = vst [vmem:[%s1995_s20 + $0x1a0] sm:$0xff] %v1031_v34  ;;  %v1047_v34 = vmul.f32 %v791_v19, %v791_v19  ;;  %v553_v17 = vld [vmem:[%s1973_s26 + $0x2b0] sm:$0xff]  ;;  %v807_v19 = vsub.f32 %v295_v8, %v551_v9  ;;  %v298_v20 = vld [vmem:[%s1965_s14 + $0x2b8] sm:$0xff]  ;;  %v299_v24 = vld [vmem:[%s1965_s14 + $0x2c0] sm:$0xff] }
  0x75   : > { %1288 = vst [vmem:[%s1995_s20 + $0x1a8] sm:$0xff] %v1032_v38  ;;  %v1048_v38 = vmul.f32 %v792_v23, %v792_v23  ;;  %v554_v21 = vld [vmem:[%s1973_s26 + $0x2b8] sm:$0xff]  ;;  %v808_v23 = vsub.f32 %v296_v12, %v552_v13  ;;  %v555_v25 = vld [vmem:[%s1973_s26 + $0x2c0] sm:$0xff]  ;;  %v300_v28 = vld [vmem:[%s1965_s14 + $0x2c8] sm:$0xff] }
  0x76   : > { %1289 = vst [vmem:[%s1995_s20 + $0x1b0] sm:$0xff] %v1033_v42  ;;  %v1049_v42 = vmul.f32 %v793_v27, %v793_v27  ;;  %v809_v27 = vsub.f32 %v297_v16, %v553_v17  ;;  %v556_v29 = vld [vmem:[%s1973_s26 + $0x2c8] sm:$0xff]  ;;  %v301_v32 = vld [vmem:[%s1965_s14 + $0x2d0] sm:$0xff]  ;;  %v302_v36 = vld [vmem:[%s1965_s14 + $0x2d8] sm:$0xff] }
  0x77   : > { %1290 = vst [vmem:[%s1995_s20 + $0x1b8] sm:$0xff] %v1034_v46  ;;  %v1050_v46 = vmul.f32 %v794_v31, %v794_v31  ;;  %v810_v31 = vsub.f32 %v298_v20, %v554_v21  ;;  %v557_v33 = vld [vmem:[%s1973_s26 + $0x2d0] sm:$0xff]  ;;  %v558_v37 = vld [vmem:[%s1973_s26 + $0x2d8] sm:$0xff]  ;;  %v303_v40 = vld [vmem:[%s1965_s14 + $0x2e0] sm:$0xff] }
  0x78   : > { %1291 = vst [vmem:[%s1995_s20 + $0x1c0] sm:$0xff] %v1035_v50  ;;  %v1051_v50 = vmul.f32 %v795_v35, %v795_v35  ;;  %v811_v35 = vsub.f32 %v299_v24, %v555_v25  ;;  %v559_v41 = vld [vmem:[%s1973_s26 + $0x2e0] sm:$0xff]  ;;  %v304_v44 = vld [vmem:[%s1965_s14 + $0x2e8] sm:$0xff]  ;;  %v305_v48 = vld [vmem:[%s1965_s14 + $0x2f0] sm:$0xff] }
  0x79   : > { %1292 = vst [vmem:[%s1995_s20 + $0x1c8] sm:$0xff] %v1036_v54  ;;  %v1052_v54 = vmul.f32 %v796_v39, %v796_v39  ;;  %v812_v39 = vsub.f32 %v300_v28, %v556_v29  ;;  %v560_v45 = vld [vmem:[%s1973_s26 + $0x2e8] sm:$0xff]  ;;  %v561_v49 = vld [vmem:[%s1973_s26 + $0x2f0] sm:$0xff]  ;;  %v306_v52 = vld [vmem:[%s1965_s14 + $0x2f8] sm:$0xff] }
  0x7a   : > { %1293 = vst [vmem:[%s1995_s20 + $0x1d0] sm:$0xff] %v1037_v58  ;;  %v1053_v58 = vmul.f32 %v797_v43, %v797_v43  ;;  %v813_v43 = vsub.f32 %v301_v32, %v557_v33  ;;  %v562_v53 = vld [vmem:[%s1973_s26 + $0x2f8] sm:$0xff]  ;;  %v307_v56 = vld [vmem:[%s1965_s14 + $0x300] sm:$0xff]  ;;  %v308_v60 = vld [vmem:[%s1965_s14 + $0x308] sm:$0xff] }
  0x7b   : > { %1294 = vst [vmem:[%s1995_s20 + $0x1d8] sm:$0xff] %v1038_v62  ;;  %v1054_v62 = vmul.f32 %v798_v47, %v798_v47  ;;  %v814_v47 = vsub.f32 %v302_v36, %v558_v37  ;;  %v563_v57 = vld [vmem:[%s1973_s26 + $0x300] sm:$0xff]  ;;  %v564_v61 = vld [vmem:[%s1973_s26 + $0x308] sm:$0xff]  ;;  %v309_v0 = vld [vmem:[%s1965_s14 + $0x310] sm:$0xff] }
  0x7c   : > { %1295 = vst [vmem:[%s1995_s20 + $0x1e0] sm:$0xff] %v1039_v2  ;;  %v1055_v2 = vmul.f32 %v799_v51, %v799_v51  ;;  %v815_v51 = vsub.f32 %v303_v40, %v559_v41  ;;  %v565_v1 = vld [vmem:[%s1973_s26 + $0x310] sm:$0xff]  ;;  %v310_v4 = vld [vmem:[%s1965_s14 + $0x318] sm:$0xff]  ;;  %v311_v8 = vld [vmem:[%s1965_s14 + $0x320] sm:$0xff] }
  0x7d   : > { %1296 = vst [vmem:[%s1995_s20 + $0x1e8] sm:$0xff] %v1040_v6  ;;  %v1056_v6 = vmul.f32 %v800_v55, %v800_v55  ;;  %v816_v55 = vsub.f32 %v304_v44, %v560_v45  ;;  %v566_v5 = vld [vmem:[%s1973_s26 + $0x318] sm:$0xff]  ;;  %v567_v9 = vld [vmem:[%s1973_s26 + $0x320] sm:$0xff]  ;;  %v312_v12 = vld [vmem:[%s1965_s14 + $0x328] sm:$0xff] }
  0x7e   : > { %1297 = vst [vmem:[%s1995_s20 + $0x1f0] sm:$0xff] %v1041_v10  ;;  %v1057_v10 = vmul.f32 %v801_v59, %v801_v59  ;;  %v817_v59 = vsub.f32 %v305_v48, %v561_v49  ;;  %v568_v13 = vld [vmem:[%s1973_s26 + $0x328] sm:$0xff]  ;;  %v313_v16 = vld [vmem:[%s1965_s14 + $0x330] sm:$0xff]  ;;  %v314_v20 = vld [vmem:[%s1965_s14 + $0x338] sm:$0xff] }
  0x7f   : > { %1298 = vst [vmem:[%s1995_s20 + $0x1f8] sm:$0xff] %v1042_v14  ;;  %v1058_v14 = vmul.f32 %v802_v63, %v802_v63  ;;  %v818_v63 = vsub.f32 %v306_v52, %v562_v53  ;;  %v569_v17 = vld [vmem:[%s1973_s26 + $0x330] sm:$0xff]  ;;  %v570_v21 = vld [vmem:[%s1973_s26 + $0x338] sm:$0xff]  ;;  %v315_v24 = vld [vmem:[%s1965_s14 + $0x340] sm:$0xff] }
  0x80   : > { %1299 = vst [vmem:[%s1995_s20 + $0x200] sm:$0xff] %v1043_v18  ;;  %v1059_v18 = vmul.f32 %v803_v3, %v803_v3  ;;  %v819_v3 = vsub.f32 %v307_v56, %v563_v57  ;;  %v571_v25 = vld [vmem:[%s1973_s26 + $0x340] sm:$0xff]  ;;  %v316_v28 = vld [vmem:[%s1965_s14 + $0x348] sm:$0xff]  ;;  %v317_v32 = vld [vmem:[%s1965_s14 + $0x350] sm:$0xff] }
  0x81   : > { %1300 = vst [vmem:[%s1995_s20 + $0x208] sm:$0xff] %v1044_v22  ;;  %v1060_v22 = vmul.f32 %v804_v7, %v804_v7  ;;  %v820_v7 = vsub.f32 %v308_v60, %v564_v61  ;;  %v572_v29 = vld [vmem:[%s1973_s26 + $0x348] sm:$0xff]  ;;  %v573_v33 = vld [vmem:[%s1973_s26 + $0x350] sm:$0xff]  ;;  %v318_v36 = vld [vmem:[%s1965_s14 + $0x358] sm:$0xff] }
  0x82   : > { %1301 = vst [vmem:[%s1995_s20 + $0x210] sm:$0xff] %v1045_v26  ;;  %v1061_v26 = vmul.f32 %v805_v11, %v805_v11  ;;  %v821_v11 = vsub.f32 %v309_v0, %v565_v1  ;;  %v574_v37 = vld [vmem:[%s1973_s26 + $0x358] sm:$0xff]  ;;  %v319_v40 = vld [vmem:[%s1965_s14 + $0x360] sm:$0xff]  ;;  %v320_v44 = vld [vmem:[%s1965_s14 + $0x368] sm:$0xff] }
  0x83   : > { %1302 = vst [vmem:[%s1995_s20 + $0x218] sm:$0xff] %v1046_v30  ;;  %v1062_v30 = vmul.f32 %v806_v15, %v806_v15  ;;  %v822_v15 = vsub.f32 %v310_v4, %v566_v5  ;;  %v575_v41 = vld [vmem:[%s1973_s26 + $0x360] sm:$0xff]  ;;  %v576_v45 = vld [vmem:[%s1973_s26 + $0x368] sm:$0xff]  ;;  %v321_v48 = vld [vmem:[%s1965_s14 + $0x370] sm:$0xff] }
  0x84   : > { %1303 = vst [vmem:[%s1995_s20 + $0x220] sm:$0xff] %v1047_v34  ;;  %v1063_v34 = vmul.f32 %v807_v19, %v807_v19  ;;  %v823_v19 = vsub.f32 %v311_v8, %v567_v9  ;;  %v577_v49 = vld [vmem:[%s1973_s26 + $0x370] sm:$0xff]  ;;  %v322_v52 = vld [vmem:[%s1965_s14 + $0x378] sm:$0xff]  ;;  %v323_v56 = vld [vmem:[%s1965_s14 + $0x380] sm:$0xff] }
  0x85   : > { %1304 = vst [vmem:[%s1995_s20 + $0x228] sm:$0xff] %v1048_v38  ;;  %v1064_v38 = vmul.f32 %v808_v23, %v808_v23  ;;  %v824_v23 = vsub.f32 %v312_v12, %v568_v13  ;;  %v578_v53 = vld [vmem:[%s1973_s26 + $0x378] sm:$0xff]  ;;  %v579_v57 = vld [vmem:[%s1973_s26 + $0x380] sm:$0xff]  ;;  %v324_v60 = vld [vmem:[%s1965_s14 + $0x388] sm:$0xff] }
  0x86   : > { %1305 = vst [vmem:[%s1995_s20 + $0x230] sm:$0xff] %v1049_v42  ;;  %v1065_v42 = vmul.f32 %v809_v27, %v809_v27  ;;  %v825_v27 = vsub.f32 %v313_v16, %v569_v17  ;;  %v580_v61 = vld [vmem:[%s1973_s26 + $0x388] sm:$0xff]  ;;  %v325_v0 = vld [vmem:[%s1965_s14 + $0x390] sm:$0xff]  ;;  %v326_v4 = vld [vmem:[%s1965_s14 + $0x398] sm:$0xff] }
  0x87   : > { %1306 = vst [vmem:[%s1995_s20 + $0x238] sm:$0xff] %v1050_v46  ;;  %v1066_v46 = vmul.f32 %v810_v31, %v810_v31  ;;  %v826_v31 = vsub.f32 %v314_v20, %v570_v21  ;;  %v581_v1 = vld [vmem:[%s1973_s26 + $0x390] sm:$0xff]  ;;  %v582_v5 = vld [vmem:[%s1973_s26 + $0x398] sm:$0xff]  ;;  %v327_v8 = vld [vmem:[%s1965_s14 + $0x3a0] sm:$0xff] }
  0x88   : > { %1307 = vst [vmem:[%s1995_s20 + $0x240] sm:$0xff] %v1051_v50  ;;  %v1067_v50 = vmul.f32 %v811_v35, %v811_v35  ;;  %v827_v35 = vsub.f32 %v315_v24, %v571_v25  ;;  %v583_v9 = vld [vmem:[%s1973_s26 + $0x3a0] sm:$0xff]  ;;  %v328_v12 = vld [vmem:[%s1965_s14 + $0x3a8] sm:$0xff]  ;;  %v329_v16 = vld [vmem:[%s1965_s14 + $0x3b0] sm:$0xff] }
  0x89   : > { %1308 = vst [vmem:[%s1995_s20 + $0x248] sm:$0xff] %v1052_v54  ;;  %v1068_v54 = vmul.f32 %v812_v39, %v812_v39  ;;  %v828_v39 = vsub.f32 %v316_v28, %v572_v29  ;;  %v584_v13 = vld [vmem:[%s1973_s26 + $0x3a8] sm:$0xff]  ;;  %v585_v17 = vld [vmem:[%s1973_s26 + $0x3b0] sm:$0xff]  ;;  %v330_v20 = vld [vmem:[%s1965_s14 + $0x3b8] sm:$0xff] }
  0x8a   : > { %1309 = vst [vmem:[%s1995_s20 + $0x250] sm:$0xff] %v1053_v58  ;;  %v1069_v58 = vmul.f32 %v813_v43, %v813_v43  ;;  %v829_v43 = vsub.f32 %v317_v32, %v573_v33  ;;  %v586_v21 = vld [vmem:[%s1973_s26 + $0x3b8] sm:$0xff]  ;;  %v331_v24 = vld [vmem:[%s1965_s14 + $0x3c0] sm:$0xff]  ;;  %v332_v28 = vld [vmem:[%s1965_s14 + $0x3c8] sm:$0xff] }
  0x8b   : > { %1310 = vst [vmem:[%s1995_s20 + $0x258] sm:$0xff] %v1054_v62  ;;  %v1070_v62 = vmul.f32 %v814_v47, %v814_v47  ;;  %v830_v47 = vsub.f32 %v318_v36, %v574_v37  ;;  %v587_v25 = vld [vmem:[%s1973_s26 + $0x3c0] sm:$0xff]  ;;  %v588_v29 = vld [vmem:[%s1973_s26 + $0x3c8] sm:$0xff]  ;;  %v333_v32 = vld [vmem:[%s1965_s14 + $0x3d0] sm:$0xff] }
  0x8c   : > { %1311 = vst [vmem:[%s1995_s20 + $0x260] sm:$0xff] %v1055_v2  ;;  %v1071_v2 = vmul.f32 %v815_v51, %v815_v51  ;;  %v831_v51 = vsub.f32 %v319_v40, %v575_v41  ;;  %v589_v33 = vld [vmem:[%s1973_s26 + $0x3d0] sm:$0xff]  ;;  %v334_v36 = vld [vmem:[%s1965_s14 + $0x3d8] sm:$0xff]  ;;  %v335_v40 = vld [vmem:[%s1965_s14 + $0x3e0] sm:$0xff] }
  0x8d   : > { %1312 = vst [vmem:[%s1995_s20 + $0x268] sm:$0xff] %v1056_v6  ;;  %v1072_v6 = vmul.f32 %v816_v55, %v816_v55  ;;  %v832_v55 = vsub.f32 %v320_v44, %v576_v45  ;;  %v590_v37 = vld [vmem:[%s1973_s26 + $0x3d8] sm:$0xff]  ;;  %v591_v41 = vld [vmem:[%s1973_s26 + $0x3e0] sm:$0xff]  ;;  %v336_v44 = vld [vmem:[%s1965_s14 + $0x3e8] sm:$0xff] }
  0x8e   : > { %1313 = vst [vmem:[%s1995_s20 + $0x270] sm:$0xff] %v1057_v10  ;;  %v1073_v10 = vmul.f32 %v817_v59, %v817_v59  ;;  %v833_v59 = vsub.f32 %v321_v48, %v577_v49  ;;  %v592_v45 = vld [vmem:[%s1973_s26 + $0x3e8] sm:$0xff]  ;;  %v337_v48 = vld [vmem:[%s1965_s14 + $0x3f0] sm:$0xff] }
  0x8f   : > { %1314 = vst [vmem:[%s1995_s20 + $0x278] sm:$0xff] %v1058_v14  ;;  %v1074_v14 = vmul.f32 %v818_v63, %v818_v63  ;;  %v834_v63 = vsub.f32 %v322_v52, %v578_v53  ;;  %v593_v49 = vld [vmem:[%s1973_s26 + $0x3f0] sm:$0xff]  ;;  %v338_v52 = vld [vmem:[%s1965_s14 + $0x3f8] sm:$0xff] }
  0x90   : > { %1315 = vst [vmem:[%s1995_s20 + $0x280] sm:$0xff] %v1059_v18  ;;  %v1075_v18 = vmul.f32 %v819_v3, %v819_v3  ;;  %v835_v3 = vsub.f32 %v323_v56, %v579_v57  ;;  %v594_v53 = vld [vmem:[%s1973_s26 + $0x3f8] sm:$0xff]  ;;  %v339_v56 = vld [vmem:[%s1965_s14 + $0x400] sm:$0xff] }
  0x91   : > { %1316 = vst [vmem:[%s1995_s20 + $0x288] sm:$0xff] %v1060_v22  ;;  %v1076_v22 = vmul.f32 %v820_v7, %v820_v7  ;;  %v836_v7 = vsub.f32 %v324_v60, %v580_v61  ;;  %v595_v57 = vld [vmem:[%s1973_s26 + $0x400] sm:$0xff]  ;;  %v340_v60 = vld [vmem:[%s1965_s14 + $0x408] sm:$0xff] }
  0x92   : > { %1317 = vst [vmem:[%s1995_s20 + $0x290] sm:$0xff] %v1061_v26  ;;  %v1077_v26 = vmul.f32 %v821_v11, %v821_v11  ;;  %v837_v11 = vsub.f32 %v325_v0, %v581_v1  ;;  %v596_v61 = vld [vmem:[%s1973_s26 + $0x408] sm:$0xff]  ;;  %v341_v0 = vld [vmem:[%s1965_s14 + $0x410] sm:$0xff] }
  0x93   : > { %1318 = vst [vmem:[%s1995_s20 + $0x298] sm:$0xff] %v1062_v30  ;;  %v1078_v30 = vmul.f32 %v822_v15, %v822_v15  ;;  %v838_v15 = vsub.f32 %v326_v4, %v582_v5  ;;  %v597_v1 = vld [vmem:[%s1973_s26 + $0x410] sm:$0xff]  ;;  %v342_v4 = vld [vmem:[%s1965_s14 + $0x418] sm:$0xff] }
  0x94   : > { %1319 = vst [vmem:[%s1995_s20 + $0x2a0] sm:$0xff] %v1063_v34  ;;  %v1079_v34 = vmul.f32 %v823_v19, %v823_v19  ;;  %v839_v19 = vsub.f32 %v327_v8, %v583_v9  ;;  %v598_v5 = vld [vmem:[%s1973_s26 + $0x418] sm:$0xff]  ;;  %v343_v8 = vld [vmem:[%s1965_s14 + $0x420] sm:$0xff] }
  0x95   : > { %1320 = vst [vmem:[%s1995_s20 + $0x2a8] sm:$0xff] %v1064_v38  ;;  %v1080_v38 = vmul.f32 %v824_v23, %v824_v23  ;;  %v840_v23 = vsub.f32 %v328_v12, %v584_v13  ;;  %v599_v9 = vld [vmem:[%s1973_s26 + $0x420] sm:$0xff]  ;;  %v344_v12 = vld [vmem:[%s1965_s14 + $0x428] sm:$0xff] }
  0x96   : > { %1321 = vst [vmem:[%s1995_s20 + $0x2b0] sm:$0xff] %v1065_v42  ;;  %v1081_v42 = vmul.f32 %v825_v27, %v825_v27  ;;  %v841_v27 = vsub.f32 %v329_v16, %v585_v17  ;;  %v600_v13 = vld [vmem:[%s1973_s26 + $0x428] sm:$0xff]  ;;  %v345_v16 = vld [vmem:[%s1965_s14 + $0x430] sm:$0xff] }
  0x97   : > { %1322 = vst [vmem:[%s1995_s20 + $0x2b8] sm:$0xff] %v1066_v46  ;;  %v1082_v46 = vmul.f32 %v826_v31, %v826_v31  ;;  %v842_v31 = vsub.f32 %v330_v20, %v586_v21  ;;  %v601_v17 = vld [vmem:[%s1973_s26 + $0x430] sm:$0xff]  ;;  %v346_v20 = vld [vmem:[%s1965_s14 + $0x438] sm:$0xff] }
  0x98   : > { %1323 = vst [vmem:[%s1995_s20 + $0x2c0] sm:$0xff] %v1067_v50  ;;  %v1083_v50 = vmul.f32 %v827_v35, %v827_v35  ;;  %v843_v35 = vsub.f32 %v331_v24, %v587_v25  ;;  %v602_v21 = vld [vmem:[%s1973_s26 + $0x438] sm:$0xff]  ;;  %v347_v24 = vld [vmem:[%s1965_s14 + $0x440] sm:$0xff] }
  0x99   : > { %1324 = vst [vmem:[%s1995_s20 + $0x2c8] sm:$0xff] %v1068_v54  ;;  %v1084_v54 = vmul.f32 %v828_v39, %v828_v39  ;;  %v844_v39 = vsub.f32 %v332_v28, %v588_v29  ;;  %v603_v25 = vld [vmem:[%s1973_s26 + $0x440] sm:$0xff]  ;;  %v348_v28 = vld [vmem:[%s1965_s14 + $0x448] sm:$0xff] }
  0x9a   : > { %1325 = vst [vmem:[%s1995_s20 + $0x2d0] sm:$0xff] %v1069_v58  ;;  %v1085_v58 = vmul.f32 %v829_v43, %v829_v43  ;;  %v845_v43 = vsub.f32 %v333_v32, %v589_v33  ;;  %v604_v29 = vld [vmem:[%s1973_s26 + $0x448] sm:$0xff]  ;;  %v349_v32 = vld [vmem:[%s1965_s14 + $0x450] sm:$0xff] }
  0x9b   : > { %1326 = vst [vmem:[%s1995_s20 + $0x2d8] sm:$0xff] %v1070_v62  ;;  %v1086_v62 = vmul.f32 %v830_v47, %v830_v47  ;;  %v846_v47 = vsub.f32 %v334_v36, %v590_v37  ;;  %v605_v33 = vld [vmem:[%s1973_s26 + $0x450] sm:$0xff]  ;;  %v350_v36 = vld [vmem:[%s1965_s14 + $0x458] sm:$0xff] }
  0x9c   : > { %1327 = vst [vmem:[%s1995_s20 + $0x2e0] sm:$0xff] %v1071_v2  ;;  %v1087_v2 = vmul.f32 %v831_v51, %v831_v51  ;;  %v847_v51 = vsub.f32 %v335_v40, %v591_v41  ;;  %v606_v37 = vld [vmem:[%s1973_s26 + $0x458] sm:$0xff]  ;;  %v351_v40 = vld [vmem:[%s1965_s14 + $0x460] sm:$0xff] }
  0x9d   : > { %1328 = vst [vmem:[%s1995_s20 + $0x2e8] sm:$0xff] %v1072_v6  ;;  %v1088_v6 = vmul.f32 %v832_v55, %v832_v55  ;;  %v848_v55 = vsub.f32 %v336_v44, %v592_v45  ;;  %v607_v41 = vld [vmem:[%s1973_s26 + $0x460] sm:$0xff]  ;;  %v352_v44 = vld [vmem:[%s1965_s14 + $0x468] sm:$0xff] }
  0x9e   : > { %1329 = vst [vmem:[%s1995_s20 + $0x2f0] sm:$0xff] %v1073_v10  ;;  %v1089_v10 = vmul.f32 %v833_v59, %v833_v59  ;;  %v849_v59 = vsub.f32 %v337_v48, %v593_v49  ;;  %v608_v45 = vld [vmem:[%s1973_s26 + $0x468] sm:$0xff]  ;;  %v353_v48 = vld [vmem:[%s1965_s14 + $0x470] sm:$0xff] }
  0x9f   : > { %1330 = vst [vmem:[%s1995_s20 + $0x2f8] sm:$0xff] %v1074_v14  ;;  %v1090_v14 = vmul.f32 %v834_v63, %v834_v63  ;;  %v850_v63 = vsub.f32 %v338_v52, %v594_v53  ;;  %v609_v49 = vld [vmem:[%s1973_s26 + $0x470] sm:$0xff]  ;;  %v354_v52 = vld [vmem:[%s1965_s14 + $0x478] sm:$0xff] }
  0xa0   : > { %1331 = vst [vmem:[%s1995_s20 + $0x300] sm:$0xff] %v1075_v18  ;;  %v1091_v18 = vmul.f32 %v835_v3, %v835_v3  ;;  %v851_v3 = vsub.f32 %v339_v56, %v595_v57  ;;  %v610_v53 = vld [vmem:[%s1973_s26 + $0x478] sm:$0xff]  ;;  %v355_v56 = vld [vmem:[%s1965_s14 + $0x480] sm:$0xff] }
  0xa1   : > { %1332 = vst [vmem:[%s1995_s20 + $0x308] sm:$0xff] %v1076_v22  ;;  %v1092_v22 = vmul.f32 %v836_v7, %v836_v7  ;;  %v852_v7 = vsub.f32 %v340_v60, %v596_v61  ;;  %v611_v57 = vld [vmem:[%s1973_s26 + $0x480] sm:$0xff]  ;;  %v356_v60 = vld [vmem:[%s1965_s14 + $0x488] sm:$0xff] }
  0xa2   : > { %1333 = vst [vmem:[%s1995_s20 + $0x310] sm:$0xff] %v1077_v26  ;;  %v1093_v26 = vmul.f32 %v837_v11, %v837_v11  ;;  %v853_v11 = vsub.f32 %v341_v0, %v597_v1  ;;  %v612_v61 = vld [vmem:[%s1973_s26 + $0x488] sm:$0xff]  ;;  %v357_v0 = vld [vmem:[%s1965_s14 + $0x490] sm:$0xff] }
  0xa3   : > { %1334 = vst [vmem:[%s1995_s20 + $0x318] sm:$0xff] %v1078_v30  ;;  %v1094_v30 = vmul.f32 %v838_v15, %v838_v15  ;;  %v854_v15 = vsub.f32 %v342_v4, %v598_v5  ;;  %v613_v1 = vld [vmem:[%s1973_s26 + $0x490] sm:$0xff]  ;;  %v358_v4 = vld [vmem:[%s1965_s14 + $0x498] sm:$0xff] }
  0xa4   : > { %1335 = vst [vmem:[%s1995_s20 + $0x320] sm:$0xff] %v1079_v34  ;;  %v1095_v34 = vmul.f32 %v839_v19, %v839_v19  ;;  %v855_v19 = vsub.f32 %v343_v8, %v599_v9  ;;  %v614_v5 = vld [vmem:[%s1973_s26 + $0x498] sm:$0xff]  ;;  %v359_v8 = vld [vmem:[%s1965_s14 + $0x4a0] sm:$0xff] }
  0xa5   : > { %1336 = vst [vmem:[%s1995_s20 + $0x328] sm:$0xff] %v1080_v38  ;;  %v1096_v38 = vmul.f32 %v840_v23, %v840_v23  ;;  %v856_v23 = vsub.f32 %v344_v12, %v600_v13  ;;  %v615_v9 = vld [vmem:[%s1973_s26 + $0x4a0] sm:$0xff]  ;;  %v360_v12 = vld [vmem:[%s1965_s14 + $0x4a8] sm:$0xff] }
  0xa6   : > { %1337 = vst [vmem:[%s1995_s20 + $0x330] sm:$0xff] %v1081_v42  ;;  %v1097_v42 = vmul.f32 %v841_v27, %v841_v27  ;;  %v857_v27 = vsub.f32 %v345_v16, %v601_v17  ;;  %v616_v13 = vld [vmem:[%s1973_s26 + $0x4a8] sm:$0xff]  ;;  %v361_v16 = vld [vmem:[%s1965_s14 + $0x4b0] sm:$0xff] }
  0xa7   : > { %1338 = vst [vmem:[%s1995_s20 + $0x338] sm:$0xff] %v1082_v46  ;;  %v1098_v46 = vmul.f32 %v842_v31, %v842_v31  ;;  %v858_v31 = vsub.f32 %v346_v20, %v602_v21  ;;  %v617_v17 = vld [vmem:[%s1973_s26 + $0x4b0] sm:$0xff]  ;;  %v362_v20 = vld [vmem:[%s1965_s14 + $0x4b8] sm:$0xff] }
  0xa8   : > { %1339 = vst [vmem:[%s1995_s20 + $0x340] sm:$0xff] %v1083_v50  ;;  %v1099_v50 = vmul.f32 %v843_v35, %v843_v35  ;;  %v859_v35 = vsub.f32 %v347_v24, %v603_v25  ;;  %v618_v21 = vld [vmem:[%s1973_s26 + $0x4b8] sm:$0xff]  ;;  %v363_v24 = vld [vmem:[%s1965_s14 + $0x4c0] sm:$0xff] }
  0xa9   : > { %1340 = vst [vmem:[%s1995_s20 + $0x348] sm:$0xff] %v1084_v54  ;;  %v1100_v54 = vmul.f32 %v844_v39, %v844_v39  ;;  %v860_v39 = vsub.f32 %v348_v28, %v604_v29  ;;  %v619_v25 = vld [vmem:[%s1973_s26 + $0x4c0] sm:$0xff]  ;;  %v364_v28 = vld [vmem:[%s1965_s14 + $0x4c8] sm:$0xff] }
  0xaa   : > { %1341 = vst [vmem:[%s1995_s20 + $0x350] sm:$0xff] %v1085_v58  ;;  %v1101_v58 = vmul.f32 %v845_v43, %v845_v43  ;;  %v861_v43 = vsub.f32 %v349_v32, %v605_v33  ;;  %v620_v29 = vld [vmem:[%s1973_s26 + $0x4c8] sm:$0xff]  ;;  %v365_v32 = vld [vmem:[%s1965_s14 + $0x4d0] sm:$0xff] }
  0xab   : > { %1342 = vst [vmem:[%s1995_s20 + $0x358] sm:$0xff] %v1086_v62  ;;  %v1102_v62 = vmul.f32 %v846_v47, %v846_v47  ;;  %v862_v47 = vsub.f32 %v350_v36, %v606_v37  ;;  %v621_v33 = vld [vmem:[%s1973_s26 + $0x4d0] sm:$0xff]  ;;  %v366_v36 = vld [vmem:[%s1965_s14 + $0x4d8] sm:$0xff] }
  0xac   : > { %1343 = vst [vmem:[%s1995_s20 + $0x360] sm:$0xff] %v1087_v2  ;;  %v1103_v2 = vmul.f32 %v847_v51, %v847_v51  ;;  %v863_v51 = vsub.f32 %v351_v40, %v607_v41  ;;  %v622_v37 = vld [vmem:[%s1973_s26 + $0x4d8] sm:$0xff]  ;;  %v367_v40 = vld [vmem:[%s1965_s14 + $0x4e0] sm:$0xff] }
  0xad   : > { %1344 = vst [vmem:[%s1995_s20 + $0x368] sm:$0xff] %v1088_v6  ;;  %v1104_v6 = vmul.f32 %v848_v55, %v848_v55  ;;  %v864_v55 = vsub.f32 %v352_v44, %v608_v45  ;;  %v623_v41 = vld [vmem:[%s1973_s26 + $0x4e0] sm:$0xff]  ;;  %v368_v44 = vld [vmem:[%s1965_s14 + $0x4e8] sm:$0xff] }
  0xae   : > { %1345 = vst [vmem:[%s1995_s20 + $0x370] sm:$0xff] %v1089_v10  ;;  %v1105_v10 = vmul.f32 %v849_v59, %v849_v59  ;;  %v865_v59 = vsub.f32 %v353_v48, %v609_v49  ;;  %v624_v45 = vld [vmem:[%s1973_s26 + $0x4e8] sm:$0xff]  ;;  %v369_v48 = vld [vmem:[%s1965_s14 + $0x4f0] sm:$0xff] }
  0xaf   : > { %1346 = vst [vmem:[%s1995_s20 + $0x378] sm:$0xff] %v1090_v14  ;;  %v1106_v14 = vmul.f32 %v850_v63, %v850_v63  ;;  %v866_v63 = vsub.f32 %v354_v52, %v610_v53  ;;  %v625_v49 = vld [vmem:[%s1973_s26 + $0x4f0] sm:$0xff]  ;;  %v370_v52 = vld [vmem:[%s1965_s14 + $0x4f8] sm:$0xff] }
  0xb0   : > { %1347 = vst [vmem:[%s1995_s20 + $0x380] sm:$0xff] %v1091_v18  ;;  %v1107_v18 = vmul.f32 %v851_v3, %v851_v3  ;;  %v867_v3 = vsub.f32 %v355_v56, %v611_v57  ;;  %v626_v53 = vld [vmem:[%s1973_s26 + $0x4f8] sm:$0xff]  ;;  %v371_v56 = vld [vmem:[%s1965_s14 + $0x500] sm:$0xff] }
  0xb1   : > { %1348 = vst [vmem:[%s1995_s20 + $0x388] sm:$0xff] %v1092_v22  ;;  %v1108_v22 = vmul.f32 %v852_v7, %v852_v7  ;;  %v868_v7 = vsub.f32 %v356_v60, %v612_v61  ;;  %v627_v57 = vld [vmem:[%s1973_s26 + $0x500] sm:$0xff]  ;;  %v372_v60 = vld [vmem:[%s1965_s14 + $0x508] sm:$0xff] }
  0xb2   : > { %1349 = vst [vmem:[%s1995_s20 + $0x390] sm:$0xff] %v1093_v26  ;;  %v1109_v26 = vmul.f32 %v853_v11, %v853_v11  ;;  %v869_v11 = vsub.f32 %v357_v0, %v613_v1  ;;  %v628_v61 = vld [vmem:[%s1973_s26 + $0x508] sm:$0xff]  ;;  %v373_v0 = vld [vmem:[%s1965_s14 + $0x510] sm:$0xff] }
  0xb3   : > { %1350 = vst [vmem:[%s1995_s20 + $0x398] sm:$0xff] %v1094_v30  ;;  %v1110_v30 = vmul.f32 %v854_v15, %v854_v15  ;;  %v870_v15 = vsub.f32 %v358_v4, %v614_v5  ;;  %v629_v1 = vld [vmem:[%s1973_s26 + $0x510] sm:$0xff]  ;;  %v374_v4 = vld [vmem:[%s1965_s14 + $0x518] sm:$0xff] }
  0xb4   : > { %1351 = vst [vmem:[%s1995_s20 + $0x3a0] sm:$0xff] %v1095_v34  ;;  %v1111_v34 = vmul.f32 %v855_v19, %v855_v19  ;;  %v871_v19 = vsub.f32 %v359_v8, %v615_v9  ;;  %v630_v5 = vld [vmem:[%s1973_s26 + $0x518] sm:$0xff]  ;;  %v375_v8 = vld [vmem:[%s1965_s14 + $0x520] sm:$0xff] }
  0xb5   : > { %1352 = vst [vmem:[%s1995_s20 + $0x3a8] sm:$0xff] %v1096_v38  ;;  %v1112_v38 = vmul.f32 %v856_v23, %v856_v23  ;;  %v872_v23 = vsub.f32 %v360_v12, %v616_v13  ;;  %v631_v9 = vld [vmem:[%s1973_s26 + $0x520] sm:$0xff]  ;;  %v376_v12 = vld [vmem:[%s1965_s14 + $0x528] sm:$0xff] }
  0xb6   : > { %1353 = vst [vmem:[%s1995_s20 + $0x3b0] sm:$0xff] %v1097_v42  ;;  %v1113_v42 = vmul.f32 %v857_v27, %v857_v27  ;;  %v873_v27 = vsub.f32 %v361_v16, %v617_v17  ;;  %v632_v13 = vld [vmem:[%s1973_s26 + $0x528] sm:$0xff]  ;;  %v377_v16 = vld [vmem:[%s1965_s14 + $0x530] sm:$0xff] }
  0xb7   : > { %1354 = vst [vmem:[%s1995_s20 + $0x3b8] sm:$0xff] %v1098_v46  ;;  %v1114_v46 = vmul.f32 %v858_v31, %v858_v31  ;;  %v874_v31 = vsub.f32 %v362_v20, %v618_v21  ;;  %v633_v17 = vld [vmem:[%s1973_s26 + $0x530] sm:$0xff]  ;;  %v378_v20 = vld [vmem:[%s1965_s14 + $0x538] sm:$0xff] }
  0xb8   : > { %1355 = vst [vmem:[%s1995_s20 + $0x3c0] sm:$0xff] %v1099_v50  ;;  %v1115_v50 = vmul.f32 %v859_v35, %v859_v35  ;;  %v875_v35 = vsub.f32 %v363_v24, %v619_v25  ;;  %v634_v21 = vld [vmem:[%s1973_s26 + $0x538] sm:$0xff]  ;;  %v379_v24 = vld [vmem:[%s1965_s14 + $0x540] sm:$0xff] }
  0xb9   : > { %1356 = vst [vmem:[%s1995_s20 + $0x3c8] sm:$0xff] %v1100_v54  ;;  %v1116_v54 = vmul.f32 %v860_v39, %v860_v39  ;;  %v876_v39 = vsub.f32 %v364_v28, %v620_v29  ;;  %v635_v25 = vld [vmem:[%s1973_s26 + $0x540] sm:$0xff]  ;;  %v380_v28 = vld [vmem:[%s1965_s14 + $0x548] sm:$0xff] }
  0xba   : > { %1357 = vst [vmem:[%s1995_s20 + $0x3d0] sm:$0xff] %v1101_v58  ;;  %v1117_v58 = vmul.f32 %v861_v43, %v861_v43  ;;  %v877_v43 = vsub.f32 %v365_v32, %v621_v33  ;;  %v636_v29 = vld [vmem:[%s1973_s26 + $0x548] sm:$0xff]  ;;  %v381_v32 = vld [vmem:[%s1965_s14 + $0x550] sm:$0xff] }
  0xbb   : > { %1358 = vst [vmem:[%s1995_s20 + $0x3d8] sm:$0xff] %v1102_v62  ;;  %v1118_v62 = vmul.f32 %v862_v47, %v862_v47  ;;  %v878_v47 = vsub.f32 %v366_v36, %v622_v37  ;;  %v637_v33 = vld [vmem:[%s1973_s26 + $0x550] sm:$0xff]  ;;  %v382_v36 = vld [vmem:[%s1965_s14 + $0x558] sm:$0xff] }
  0xbc   : > { %1359 = vst [vmem:[%s1995_s20 + $0x3e0] sm:$0xff] %v1103_v2  ;;  %v1119_v2 = vmul.f32 %v863_v51, %v863_v51  ;;  %v879_v51 = vsub.f32 %v367_v40, %v623_v41  ;;  %v638_v37 = vld [vmem:[%s1973_s26 + $0x558] sm:$0xff]  ;;  %v383_v40 = vld [vmem:[%s1965_s14 + $0x560] sm:$0xff] }
  0xbd   : > { %1360 = vst [vmem:[%s1995_s20 + $0x3e8] sm:$0xff] %v1104_v6  ;;  %v1120_v6 = vmul.f32 %v864_v55, %v864_v55  ;;  %v880_v55 = vsub.f32 %v368_v44, %v624_v45  ;;  %v639_v41 = vld [vmem:[%s1973_s26 + $0x560] sm:$0xff]  ;;  %v384_v44 = vld [vmem:[%s1965_s14 + $0x568] sm:$0xff] }
  0xbe   : > { %1361 = vst [vmem:[%s1995_s20 + $0x3f0] sm:$0xff] %v1105_v10  ;;  %v1121_v10 = vmul.f32 %v865_v59, %v865_v59  ;;  %v881_v59 = vsub.f32 %v369_v48, %v625_v49  ;;  %v640_v45 = vld [vmem:[%s1973_s26 + $0x568] sm:$0xff]  ;;  %v385_v48 = vld [vmem:[%s1965_s14 + $0x570] sm:$0xff] }
  0xbf   : > { %1362 = vst [vmem:[%s1995_s20 + $0x3f8] sm:$0xff] %v1106_v14  ;;  %v1122_v14 = vmul.f32 %v866_v63, %v866_v63  ;;  %v882_v63 = vsub.f32 %v370_v52, %v626_v53  ;;  %v641_v49 = vld [vmem:[%s1973_s26 + $0x570] sm:$0xff]  ;;  %v386_v52 = vld [vmem:[%s1965_s14 + $0x578] sm:$0xff] }
  0xc0   : > { %1363 = vst [vmem:[%s1995_s20 + $0x400] sm:$0xff] %v1107_v18  ;;  %v1123_v18 = vmul.f32 %v867_v3, %v867_v3  ;;  %v883_v3 = vsub.f32 %v371_v56, %v627_v57  ;;  %v642_v53 = vld [vmem:[%s1973_s26 + $0x578] sm:$0xff]  ;;  %v387_v56 = vld [vmem:[%s1965_s14 + $0x580] sm:$0xff] }
  0xc1   : > { %1364 = vst [vmem:[%s1995_s20 + $0x408] sm:$0xff] %v1108_v22  ;;  %v1124_v22 = vmul.f32 %v868_v7, %v868_v7  ;;  %v884_v7 = vsub.f32 %v372_v60, %v628_v61  ;;  %v643_v57 = vld [vmem:[%s1973_s26 + $0x580] sm:$0xff]  ;;  %v388_v60 = vld [vmem:[%s1965_s14 + $0x588] sm:$0xff] }
  0xc2   : > { %1365 = vst [vmem:[%s1995_s20 + $0x410] sm:$0xff] %v1109_v26  ;;  %v1125_v26 = vmul.f32 %v869_v11, %v869_v11  ;;  %v885_v11 = vsub.f32 %v373_v0, %v629_v1  ;;  %v644_v61 = vld [vmem:[%s1973_s26 + $0x588] sm:$0xff]  ;;  %v389_v0 = vld [vmem:[%s1965_s14 + $0x590] sm:$0xff] }
  0xc3   : > { %1366 = vst [vmem:[%s1995_s20 + $0x418] sm:$0xff] %v1110_v30  ;;  %v1126_v30 = vmul.f32 %v870_v15, %v870_v15  ;;  %v886_v15 = vsub.f32 %v374_v4, %v630_v5  ;;  %v645_v1 = vld [vmem:[%s1973_s26 + $0x590] sm:$0xff]  ;;  %v390_v4 = vld [vmem:[%s1965_s14 + $0x598] sm:$0xff] }
  0xc4   : > { %1367 = vst [vmem:[%s1995_s20 + $0x420] sm:$0xff] %v1111_v34  ;;  %v1127_v34 = vmul.f32 %v871_v19, %v871_v19  ;;  %v887_v19 = vsub.f32 %v375_v8, %v631_v9  ;;  %v646_v5 = vld [vmem:[%s1973_s26 + $0x598] sm:$0xff]  ;;  %v391_v8 = vld [vmem:[%s1965_s14 + $0x5a0] sm:$0xff] }
  0xc5   : > { %1368 = vst [vmem:[%s1995_s20 + $0x428] sm:$0xff] %v1112_v38  ;;  %v1128_v38 = vmul.f32 %v872_v23, %v872_v23  ;;  %v888_v23 = vsub.f32 %v376_v12, %v632_v13  ;;  %v647_v9 = vld [vmem:[%s1973_s26 + $0x5a0] sm:$0xff]  ;;  %v392_v12 = vld [vmem:[%s1965_s14 + $0x5a8] sm:$0xff] }
  0xc6   : > { %1369 = vst [vmem:[%s1995_s20 + $0x430] sm:$0xff] %v1113_v42  ;;  %v1129_v42 = vmul.f32 %v873_v27, %v873_v27  ;;  %v889_v27 = vsub.f32 %v377_v16, %v633_v17  ;;  %v648_v13 = vld [vmem:[%s1973_s26 + $0x5a8] sm:$0xff]  ;;  %v393_v16 = vld [vmem:[%s1965_s14 + $0x5b0] sm:$0xff] }
  0xc7   : > { %1370 = vst [vmem:[%s1995_s20 + $0x438] sm:$0xff] %v1114_v46  ;;  %v1130_v46 = vmul.f32 %v874_v31, %v874_v31  ;;  %v890_v31 = vsub.f32 %v378_v20, %v634_v21  ;;  %v649_v17 = vld [vmem:[%s1973_s26 + $0x5b0] sm:$0xff]  ;;  %v394_v20 = vld [vmem:[%s1965_s14 + $0x5b8] sm:$0xff] }
  0xc8   : > { %1371 = vst [vmem:[%s1995_s20 + $0x440] sm:$0xff] %v1115_v50  ;;  %v1131_v50 = vmul.f32 %v875_v35, %v875_v35  ;;  %v891_v35 = vsub.f32 %v379_v24, %v635_v25  ;;  %v650_v21 = vld [vmem:[%s1973_s26 + $0x5b8] sm:$0xff]  ;;  %v395_v24 = vld [vmem:[%s1965_s14 + $0x5c0] sm:$0xff] }
  0xc9   : > { %1372 = vst [vmem:[%s1995_s20 + $0x448] sm:$0xff] %v1116_v54  ;;  %v1132_v54 = vmul.f32 %v876_v39, %v876_v39  ;;  %v892_v39 = vsub.f32 %v380_v28, %v636_v29  ;;  %v651_v25 = vld [vmem:[%s1973_s26 + $0x5c0] sm:$0xff]  ;;  %v396_v28 = vld [vmem:[%s1965_s14 + $0x5c8] sm:$0xff] }
  0xca   : > { %1373 = vst [vmem:[%s1995_s20 + $0x450] sm:$0xff] %v1117_v58  ;;  %v1133_v58 = vmul.f32 %v877_v43, %v877_v43  ;;  %v893_v43 = vsub.f32 %v381_v32, %v637_v33  ;;  %v652_v29 = vld [vmem:[%s1973_s26 + $0x5c8] sm:$0xff]  ;;  %v397_v32 = vld [vmem:[%s1965_s14 + $0x5d0] sm:$0xff] }
  0xcb   : > { %1374 = vst [vmem:[%s1995_s20 + $0x458] sm:$0xff] %v1118_v62  ;;  %v1134_v62 = vmul.f32 %v878_v47, %v878_v47  ;;  %v894_v47 = vsub.f32 %v382_v36, %v638_v37  ;;  %v653_v33 = vld [vmem:[%s1973_s26 + $0x5d0] sm:$0xff]  ;;  %v398_v36 = vld [vmem:[%s1965_s14 + $0x5d8] sm:$0xff] }
  0xcc   : > { %1375 = vst [vmem:[%s1995_s20 + $0x460] sm:$0xff] %v1119_v2  ;;  %v1135_v2 = vmul.f32 %v879_v51, %v879_v51  ;;  %v895_v51 = vsub.f32 %v383_v40, %v639_v41  ;;  %v654_v37 = vld [vmem:[%s1973_s26 + $0x5d8] sm:$0xff]  ;;  %v399_v40 = vld [vmem:[%s1965_s14 + $0x5e0] sm:$0xff] }
  0xcd   : > { %1376 = vst [vmem:[%s1995_s20 + $0x468] sm:$0xff] %v1120_v6  ;;  %v1136_v6 = vmul.f32 %v880_v55, %v880_v55  ;;  %v896_v55 = vsub.f32 %v384_v44, %v640_v45  ;;  %v655_v41 = vld [vmem:[%s1973_s26 + $0x5e0] sm:$0xff]  ;;  %v400_v44 = vld [vmem:[%s1965_s14 + $0x5e8] sm:$0xff] }
  0xce   : > { %1377 = vst [vmem:[%s1995_s20 + $0x470] sm:$0xff] %v1121_v10  ;;  %v1137_v10 = vmul.f32 %v881_v59, %v881_v59  ;;  %v897_v59 = vsub.f32 %v385_v48, %v641_v49  ;;  %v656_v45 = vld [vmem:[%s1973_s26 + $0x5e8] sm:$0xff]  ;;  %v401_v48 = vld [vmem:[%s1965_s14 + $0x5f0] sm:$0xff] }
  0xcf   : > { %1378 = vst [vmem:[%s1995_s20 + $0x478] sm:$0xff] %v1122_v14  ;;  %v1138_v14 = vmul.f32 %v882_v63, %v882_v63  ;;  %v898_v63 = vsub.f32 %v386_v52, %v642_v53  ;;  %v657_v49 = vld [vmem:[%s1973_s26 + $0x5f0] sm:$0xff]  ;;  %v402_v52 = vld [vmem:[%s1965_s14 + $0x5f8] sm:$0xff] }
  0xd0   : > { %1379 = vst [vmem:[%s1995_s20 + $0x480] sm:$0xff] %v1123_v18  ;;  %v1139_v18 = vmul.f32 %v883_v3, %v883_v3  ;;  %v899_v3 = vsub.f32 %v387_v56, %v643_v57  ;;  %v658_v53 = vld [vmem:[%s1973_s26 + $0x5f8] sm:$0xff]  ;;  %v403_v56 = vld [vmem:[%s1965_s14 + $0x600] sm:$0xff] }
  0xd1   : > { %1380 = vst [vmem:[%s1995_s20 + $0x488] sm:$0xff] %v1124_v22  ;;  %v1140_v22 = vmul.f32 %v884_v7, %v884_v7  ;;  %v900_v7 = vsub.f32 %v388_v60, %v644_v61  ;;  %v659_v57 = vld [vmem:[%s1973_s26 + $0x600] sm:$0xff]  ;;  %v404_v60 = vld [vmem:[%s1965_s14 + $0x608] sm:$0xff] }
  0xd2   : > { %1381 = vst [vmem:[%s1995_s20 + $0x490] sm:$0xff] %v1125_v26  ;;  %v1141_v26 = vmul.f32 %v885_v11, %v885_v11  ;;  %v901_v11 = vsub.f32 %v389_v0, %v645_v1  ;;  %v660_v61 = vld [vmem:[%s1973_s26 + $0x608] sm:$0xff]  ;;  %v405_v0 = vld [vmem:[%s1965_s14 + $0x610] sm:$0xff] }
  0xd3   : > { %1382 = vst [vmem:[%s1995_s20 + $0x498] sm:$0xff] %v1126_v30  ;;  %v1142_v30 = vmul.f32 %v886_v15, %v886_v15  ;;  %v902_v15 = vsub.f32 %v390_v4, %v646_v5  ;;  %v661_v1 = vld [vmem:[%s1973_s26 + $0x610] sm:$0xff]  ;;  %v406_v4 = vld [vmem:[%s1965_s14 + $0x618] sm:$0xff] }
  0xd4   : > { %1383 = vst [vmem:[%s1995_s20 + $0x4a0] sm:$0xff] %v1127_v34  ;;  %v1143_v34 = vmul.f32 %v887_v19, %v887_v19  ;;  %v903_v19 = vsub.f32 %v391_v8, %v647_v9  ;;  %v662_v5 = vld [vmem:[%s1973_s26 + $0x618] sm:$0xff]  ;;  %v407_v8 = vld [vmem:[%s1965_s14 + $0x620] sm:$0xff] }
  0xd5   : > { %1384 = vst [vmem:[%s1995_s20 + $0x4a8] sm:$0xff] %v1128_v38  ;;  %v1144_v38 = vmul.f32 %v888_v23, %v888_v23  ;;  %v904_v23 = vsub.f32 %v392_v12, %v648_v13  ;;  %v663_v9 = vld [vmem:[%s1973_s26 + $0x620] sm:$0xff]  ;;  %v408_v12 = vld [vmem:[%s1965_s14 + $0x628] sm:$0xff] }
  0xd6   : > { %1385 = vst [vmem:[%s1995_s20 + $0x4b0] sm:$0xff] %v1129_v42  ;;  %v1145_v42 = vmul.f32 %v889_v27, %v889_v27  ;;  %v905_v27 = vsub.f32 %v393_v16, %v649_v17  ;;  %v664_v13 = vld [vmem:[%s1973_s26 + $0x628] sm:$0xff]  ;;  %v409_v16 = vld [vmem:[%s1965_s14 + $0x630] sm:$0xff] }
  0xd7   : > { %1386 = vst [vmem:[%s1995_s20 + $0x4b8] sm:$0xff] %v1130_v46  ;;  %v1146_v46 = vmul.f32 %v890_v31, %v890_v31  ;;  %v906_v31 = vsub.f32 %v394_v20, %v650_v21  ;;  %v665_v17 = vld [vmem:[%s1973_s26 + $0x630] sm:$0xff]  ;;  %v410_v20 = vld [vmem:[%s1965_s14 + $0x638] sm:$0xff] }
  0xd8   : > { %1387 = vst [vmem:[%s1995_s20 + $0x4c0] sm:$0xff] %v1131_v50  ;;  %v1147_v50 = vmul.f32 %v891_v35, %v891_v35  ;;  %v907_v35 = vsub.f32 %v395_v24, %v651_v25  ;;  %v666_v21 = vld [vmem:[%s1973_s26 + $0x638] sm:$0xff]  ;;  %v411_v24 = vld [vmem:[%s1965_s14 + $0x640] sm:$0xff] }
  0xd9   : > { %1388 = vst [vmem:[%s1995_s20 + $0x4c8] sm:$0xff] %v1132_v54  ;;  %v1148_v54 = vmul.f32 %v892_v39, %v892_v39  ;;  %v908_v39 = vsub.f32 %v396_v28, %v652_v29  ;;  %v667_v25 = vld [vmem:[%s1973_s26 + $0x640] sm:$0xff]  ;;  %v412_v28 = vld [vmem:[%s1965_s14 + $0x648] sm:$0xff] }
  0xda   : > { %1389 = vst [vmem:[%s1995_s20 + $0x4d0] sm:$0xff] %v1133_v58  ;;  %v1149_v58 = vmul.f32 %v893_v43, %v893_v43  ;;  %v909_v43 = vsub.f32 %v397_v32, %v653_v33  ;;  %v668_v29 = vld [vmem:[%s1973_s26 + $0x648] sm:$0xff]  ;;  %v413_v32 = vld [vmem:[%s1965_s14 + $0x650] sm:$0xff] }
  0xdb   : > { %1390 = vst [vmem:[%s1995_s20 + $0x4d8] sm:$0xff] %v1134_v62  ;;  %v1150_v62 = vmul.f32 %v894_v47, %v894_v47  ;;  %v910_v47 = vsub.f32 %v398_v36, %v654_v37  ;;  %v669_v33 = vld [vmem:[%s1973_s26 + $0x650] sm:$0xff]  ;;  %v414_v36 = vld [vmem:[%s1965_s14 + $0x658] sm:$0xff] }
  0xdc   : > { %1391 = vst [vmem:[%s1995_s20 + $0x4e0] sm:$0xff] %v1135_v2  ;;  %v1151_v2 = vmul.f32 %v895_v51, %v895_v51  ;;  %v911_v51 = vsub.f32 %v399_v40, %v655_v41  ;;  %v670_v37 = vld [vmem:[%s1973_s26 + $0x658] sm:$0xff]  ;;  %v415_v40 = vld [vmem:[%s1965_s14 + $0x660] sm:$0xff] }
  0xdd   : > { %1392 = vst [vmem:[%s1995_s20 + $0x4e8] sm:$0xff] %v1136_v6  ;;  %v1152_v6 = vmul.f32 %v896_v55, %v896_v55  ;;  %v912_v55 = vsub.f32 %v400_v44, %v656_v45  ;;  %v671_v41 = vld [vmem:[%s1973_s26 + $0x660] sm:$0xff]  ;;  %v416_v44 = vld [vmem:[%s1965_s14 + $0x668] sm:$0xff] }
  0xde   : > { %1393 = vst [vmem:[%s1995_s20 + $0x4f0] sm:$0xff] %v1137_v10  ;;  %v1153_v10 = vmul.f32 %v897_v59, %v897_v59  ;;  %v913_v59 = vsub.f32 %v401_v48, %v657_v49  ;;  %v672_v45 = vld [vmem:[%s1973_s26 + $0x668] sm:$0xff]  ;;  %v417_v48 = vld [vmem:[%s1965_s14 + $0x670] sm:$0xff] }
  0xdf   : > { %1394 = vst [vmem:[%s1995_s20 + $0x4f8] sm:$0xff] %v1138_v14  ;;  %v1154_v14 = vmul.f32 %v898_v63, %v898_v63  ;;  %v914_v63 = vsub.f32 %v402_v52, %v658_v53  ;;  %v673_v49 = vld [vmem:[%s1973_s26 + $0x670] sm:$0xff]  ;;  %v418_v52 = vld [vmem:[%s1965_s14 + $0x678] sm:$0xff] }
  0xe0   : > { %1395 = vst [vmem:[%s1995_s20 + $0x500] sm:$0xff] %v1139_v18  ;;  %v1155_v18 = vmul.f32 %v899_v3, %v899_v3  ;;  %v915_v3 = vsub.f32 %v403_v56, %v659_v57  ;;  %v674_v53 = vld [vmem:[%s1973_s26 + $0x678] sm:$0xff]  ;;  %v419_v56 = vld [vmem:[%s1965_s14 + $0x680] sm:$0xff] }
  0xe1   : > { %1396 = vst [vmem:[%s1995_s20 + $0x508] sm:$0xff] %v1140_v22  ;;  %v1156_v22 = vmul.f32 %v900_v7, %v900_v7  ;;  %v916_v7 = vsub.f32 %v404_v60, %v660_v61  ;;  %v675_v57 = vld [vmem:[%s1973_s26 + $0x680] sm:$0xff]  ;;  %v420_v60 = vld [vmem:[%s1965_s14 + $0x688] sm:$0xff] }
  0xe2   : > { %1397 = vst [vmem:[%s1995_s20 + $0x510] sm:$0xff] %v1141_v26  ;;  %v1157_v26 = vmul.f32 %v901_v11, %v901_v11  ;;  %v917_v11 = vsub.f32 %v405_v0, %v661_v1  ;;  %v676_v61 = vld [vmem:[%s1973_s26 + $0x688] sm:$0xff]  ;;  %v421_v0 = vld [vmem:[%s1965_s14 + $0x690] sm:$0xff] }
  0xe3   : > { %1398 = vst [vmem:[%s1995_s20 + $0x518] sm:$0xff] %v1142_v30  ;;  %v1158_v30 = vmul.f32 %v902_v15, %v902_v15  ;;  %v918_v15 = vsub.f32 %v406_v4, %v662_v5  ;;  %v677_v1 = vld [vmem:[%s1973_s26 + $0x690] sm:$0xff]  ;;  %v422_v4 = vld [vmem:[%s1965_s14 + $0x698] sm:$0xff] }
  0xe4   : > { %1399 = vst [vmem:[%s1995_s20 + $0x520] sm:$0xff] %v1143_v34  ;;  %v1159_v34 = vmul.f32 %v903_v19, %v903_v19  ;;  %v919_v19 = vsub.f32 %v407_v8, %v663_v9  ;;  %v678_v5 = vld [vmem:[%s1973_s26 + $0x698] sm:$0xff]  ;;  %v423_v8 = vld [vmem:[%s1965_s14 + $0x6a0] sm:$0xff] }
  0xe5   : > { %1400 = vst [vmem:[%s1995_s20 + $0x528] sm:$0xff] %v1144_v38  ;;  %v1160_v38 = vmul.f32 %v904_v23, %v904_v23  ;;  %v920_v23 = vsub.f32 %v408_v12, %v664_v13  ;;  %v679_v9 = vld [vmem:[%s1973_s26 + $0x6a0] sm:$0xff]  ;;  %v424_v12 = vld [vmem:[%s1965_s14 + $0x6a8] sm:$0xff] }
  0xe6   : > { %1401 = vst [vmem:[%s1995_s20 + $0x530] sm:$0xff] %v1145_v42  ;;  %v1161_v42 = vmul.f32 %v905_v27, %v905_v27  ;;  %v921_v27 = vsub.f32 %v409_v16, %v665_v17  ;;  %v680_v13 = vld [vmem:[%s1973_s26 + $0x6a8] sm:$0xff]  ;;  %v425_v16 = vld [vmem:[%s1965_s14 + $0x6b0] sm:$0xff] }
  0xe7   : > { %1402 = vst [vmem:[%s1995_s20 + $0x538] sm:$0xff] %v1146_v46  ;;  %v1162_v46 = vmul.f32 %v906_v31, %v906_v31  ;;  %v922_v31 = vsub.f32 %v410_v20, %v666_v21  ;;  %v681_v17 = vld [vmem:[%s1973_s26 + $0x6b0] sm:$0xff]  ;;  %v426_v20 = vld [vmem:[%s1965_s14 + $0x6b8] sm:$0xff] }
  0xe8   : > { %1403 = vst [vmem:[%s1995_s20 + $0x540] sm:$0xff] %v1147_v50  ;;  %v1163_v50 = vmul.f32 %v907_v35, %v907_v35  ;;  %v923_v35 = vsub.f32 %v411_v24, %v667_v25  ;;  %v682_v21 = vld [vmem:[%s1973_s26 + $0x6b8] sm:$0xff]  ;;  %v427_v24 = vld [vmem:[%s1965_s14 + $0x6c0] sm:$0xff] }
  0xe9   : > { %1404 = vst [vmem:[%s1995_s20 + $0x548] sm:$0xff] %v1148_v54  ;;  %v1164_v54 = vmul.f32 %v908_v39, %v908_v39  ;;  %v924_v39 = vsub.f32 %v412_v28, %v668_v29  ;;  %v683_v25 = vld [vmem:[%s1973_s26 + $0x6c0] sm:$0xff]  ;;  %v428_v28 = vld [vmem:[%s1965_s14 + $0x6c8] sm:$0xff] }
  0xea   : > { %1405 = vst [vmem:[%s1995_s20 + $0x550] sm:$0xff] %v1149_v58  ;;  %v1165_v58 = vmul.f32 %v909_v43, %v909_v43  ;;  %v925_v43 = vsub.f32 %v413_v32, %v669_v33  ;;  %v684_v29 = vld [vmem:[%s1973_s26 + $0x6c8] sm:$0xff]  ;;  %v429_v32 = vld [vmem:[%s1965_s14 + $0x6d0] sm:$0xff] }
  0xeb   : > { %1406 = vst [vmem:[%s1995_s20 + $0x558] sm:$0xff] %v1150_v62  ;;  %v1166_v62 = vmul.f32 %v910_v47, %v910_v47  ;;  %v926_v47 = vsub.f32 %v414_v36, %v670_v37  ;;  %v685_v33 = vld [vmem:[%s1973_s26 + $0x6d0] sm:$0xff]  ;;  %v430_v36 = vld [vmem:[%s1965_s14 + $0x6d8] sm:$0xff] }
  0xec   : > { %1407 = vst [vmem:[%s1995_s20 + $0x560] sm:$0xff] %v1151_v2  ;;  %v1167_v2 = vmul.f32 %v911_v51, %v911_v51  ;;  %v927_v51 = vsub.f32 %v415_v40, %v671_v41  ;;  %v686_v37 = vld [vmem:[%s1973_s26 + $0x6d8] sm:$0xff]  ;;  %v431_v40 = vld [vmem:[%s1965_s14 + $0x6e0] sm:$0xff] }
  0xed   : > { %1408 = vst [vmem:[%s1995_s20 + $0x568] sm:$0xff] %v1152_v6  ;;  %v1168_v6 = vmul.f32 %v912_v55, %v912_v55  ;;  %v928_v55 = vsub.f32 %v416_v44, %v672_v45  ;;  %v687_v41 = vld [vmem:[%s1973_s26 + $0x6e0] sm:$0xff]  ;;  %v432_v44 = vld [vmem:[%s1965_s14 + $0x6e8] sm:$0xff] }
  0xee   : > { %1409 = vst [vmem:[%s1995_s20 + $0x570] sm:$0xff] %v1153_v10  ;;  %v1169_v10 = vmul.f32 %v913_v59, %v913_v59  ;;  %v929_v59 = vsub.f32 %v417_v48, %v673_v49  ;;  %v688_v45 = vld [vmem:[%s1973_s26 + $0x6e8] sm:$0xff]  ;;  %v433_v48 = vld [vmem:[%s1965_s14 + $0x6f0] sm:$0xff] }
  0xef   : > { %1410 = vst [vmem:[%s1995_s20 + $0x578] sm:$0xff] %v1154_v14  ;;  %v1170_v14 = vmul.f32 %v914_v63, %v914_v63  ;;  %v930_v63 = vsub.f32 %v418_v52, %v674_v53  ;;  %v689_v49 = vld [vmem:[%s1973_s26 + $0x6f0] sm:$0xff]  ;;  %v434_v52 = vld [vmem:[%s1965_s14 + $0x6f8] sm:$0xff] }
  0xf0   : > { %1411 = vst [vmem:[%s1995_s20 + $0x580] sm:$0xff] %v1155_v18  ;;  %v1171_v18 = vmul.f32 %v915_v3, %v915_v3  ;;  %v931_v3 = vsub.f32 %v419_v56, %v675_v57  ;;  %v690_v53 = vld [vmem:[%s1973_s26 + $0x6f8] sm:$0xff]  ;;  %v435_v56 = vld [vmem:[%s1965_s14 + $0x700] sm:$0xff] }
  0xf1   : > { %1412 = vst [vmem:[%s1995_s20 + $0x588] sm:$0xff] %v1156_v22  ;;  %v1172_v22 = vmul.f32 %v916_v7, %v916_v7  ;;  %v932_v7 = vsub.f32 %v420_v60, %v676_v61  ;;  %v691_v57 = vld [vmem:[%s1973_s26 + $0x700] sm:$0xff]  ;;  %v436_v60 = vld [vmem:[%s1965_s14 + $0x708] sm:$0xff] }
  0xf2   : > { %1413 = vst [vmem:[%s1995_s20 + $0x590] sm:$0xff] %v1157_v26  ;;  %v1173_v26 = vmul.f32 %v917_v11, %v917_v11  ;;  %v933_v11 = vsub.f32 %v421_v0, %v677_v1  ;;  %v692_v61 = vld [vmem:[%s1973_s26 + $0x708] sm:$0xff]  ;;  %v437_v0 = vld [vmem:[%s1965_s14 + $0x710] sm:$0xff] }
  0xf3   : > { %1414 = vst [vmem:[%s1995_s20 + $0x598] sm:$0xff] %v1158_v30  ;;  %v1174_v30 = vmul.f32 %v918_v15, %v918_v15  ;;  %v934_v15 = vsub.f32 %v422_v4, %v678_v5  ;;  %v693_v1 = vld [vmem:[%s1973_s26 + $0x710] sm:$0xff]  ;;  %v438_v4 = vld [vmem:[%s1965_s14 + $0x718] sm:$0xff] }
  0xf4   : > { %1415 = vst [vmem:[%s1995_s20 + $0x5a0] sm:$0xff] %v1159_v34  ;;  %v1175_v34 = vmul.f32 %v919_v19, %v919_v19  ;;  %v935_v19 = vsub.f32 %v423_v8, %v679_v9  ;;  %v694_v5 = vld [vmem:[%s1973_s26 + $0x718] sm:$0xff]  ;;  %v439_v8 = vld [vmem:[%s1965_s14 + $0x720] sm:$0xff] }
  0xf5   : > { %1416 = vst [vmem:[%s1995_s20 + $0x5a8] sm:$0xff] %v1160_v38  ;;  %v1176_v38 = vmul.f32 %v920_v23, %v920_v23  ;;  %v936_v23 = vsub.f32 %v424_v12, %v680_v13  ;;  %v695_v9 = vld [vmem:[%s1973_s26 + $0x720] sm:$0xff]  ;;  %v440_v12 = vld [vmem:[%s1965_s14 + $0x728] sm:$0xff] }
  0xf6   : > { %1417 = vst [vmem:[%s1995_s20 + $0x5b0] sm:$0xff] %v1161_v42  ;;  %v1177_v42 = vmul.f32 %v921_v27, %v921_v27  ;;  %v937_v27 = vsub.f32 %v425_v16, %v681_v17  ;;  %v696_v13 = vld [vmem:[%s1973_s26 + $0x728] sm:$0xff]  ;;  %v441_v16 = vld [vmem:[%s1965_s14 + $0x730] sm:$0xff] }
  0xf7   : > { %1418 = vst [vmem:[%s1995_s20 + $0x5b8] sm:$0xff] %v1162_v46  ;;  %v1178_v46 = vmul.f32 %v922_v31, %v922_v31  ;;  %v938_v31 = vsub.f32 %v426_v20, %v682_v21  ;;  %v697_v17 = vld [vmem:[%s1973_s26 + $0x730] sm:$0xff]  ;;  %v442_v20 = vld [vmem:[%s1965_s14 + $0x738] sm:$0xff] }
  0xf8   : > { %1419 = vst [vmem:[%s1995_s20 + $0x5c0] sm:$0xff] %v1163_v50  ;;  %v1179_v50 = vmul.f32 %v923_v35, %v923_v35  ;;  %v939_v35 = vsub.f32 %v427_v24, %v683_v25  ;;  %v698_v21 = vld [vmem:[%s1973_s26 + $0x738] sm:$0xff]  ;;  %v443_v24 = vld [vmem:[%s1965_s14 + $0x740] sm:$0xff] }
  0xf9   : > { %1420 = vst [vmem:[%s1995_s20 + $0x5c8] sm:$0xff] %v1164_v54  ;;  %v1180_v54 = vmul.f32 %v924_v39, %v924_v39  ;;  %v940_v39 = vsub.f32 %v428_v28, %v684_v29  ;;  %v699_v25 = vld [vmem:[%s1973_s26 + $0x740] sm:$0xff]  ;;  %v444_v28 = vld [vmem:[%s1965_s14 + $0x748] sm:$0xff] }
  0xfa   : > { %1421 = vst [vmem:[%s1995_s20 + $0x5d0] sm:$0xff] %v1165_v58  ;;  %v1181_v58 = vmul.f32 %v925_v43, %v925_v43  ;;  %v941_v43 = vsub.f32 %v429_v32, %v685_v33  ;;  %v700_v29 = vld [vmem:[%s1973_s26 + $0x748] sm:$0xff]  ;;  %v445_v32 = vld [vmem:[%s1965_s14 + $0x750] sm:$0xff] }
  0xfb   : > { %1422 = vst [vmem:[%s1995_s20 + $0x5d8] sm:$0xff] %v1166_v62  ;;  %v1182_v62 = vmul.f32 %v926_v47, %v926_v47  ;;  %v942_v47 = vsub.f32 %v430_v36, %v686_v37  ;;  %v701_v33 = vld [vmem:[%s1973_s26 + $0x750] sm:$0xff]  ;;  %v446_v36 = vld [vmem:[%s1965_s14 + $0x758] sm:$0xff] }
  0xfc   : > { %1423 = vst [vmem:[%s1995_s20 + $0x5e0] sm:$0xff] %v1167_v2  ;;  %v1183_v2 = vmul.f32 %v927_v51, %v927_v51  ;;  %v943_v51 = vsub.f32 %v431_v40, %v687_v41  ;;  %v702_v37 = vld [vmem:[%s1973_s26 + $0x758] sm:$0xff]  ;;  %v447_v40 = vld [vmem:[%s1965_s14 + $0x760] sm:$0xff] }
  0xfd   : > { %1424 = vst [vmem:[%s1995_s20 + $0x5e8] sm:$0xff] %v1168_v6  ;;  %v1184_v6 = vmul.f32 %v928_v55, %v928_v55  ;;  %v944_v55 = vsub.f32 %v432_v44, %v688_v45  ;;  %v703_v41 = vld [vmem:[%s1973_s26 + $0x760] sm:$0xff]  ;;  %v448_v44 = vld [vmem:[%s1965_s14 + $0x768] sm:$0xff] }
  0xfe   : > { %1425 = vst [vmem:[%s1995_s20 + $0x5f0] sm:$0xff] %v1169_v10  ;;  %v1185_v10 = vmul.f32 %v929_v59, %v929_v59  ;;  %v945_v59 = vsub.f32 %v433_v48, %v689_v49  ;;  %v704_v45 = vld [vmem:[%s1973_s26 + $0x768] sm:$0xff]  ;;  %v449_v48 = vld [vmem:[%s1965_s14 + $0x770] sm:$0xff] }
  0xff   : > { %1426 = vst [vmem:[%s1995_s20 + $0x5f8] sm:$0xff] %v1170_v14  ;;  %v1186_v14 = vmul.f32 %v930_v63, %v930_v63  ;;  %v946_v63 = vsub.f32 %v434_v52, %v690_v53  ;;  %v705_v49 = vld [vmem:[%s1973_s26 + $0x770] sm:$0xff]  ;;  %v450_v52 = vld [vmem:[%s1965_s14 + $0x778] sm:$0xff] }
 0x100   : > { %1427 = vst [vmem:[%s1995_s20 + $0x600] sm:$0xff] %v1171_v18  ;;  %v1187_v18 = vmul.f32 %v931_v3, %v931_v3  ;;  %v947_v3 = vsub.f32 %v435_v56, %v691_v57  ;;  %v706_v53 = vld [vmem:[%s1973_s26 + $0x778] sm:$0xff]  ;;  %v451_v56 = vld [vmem:[%s1965_s14 + $0x780] sm:$0xff] }
 0x101   : > { %1428 = vst [vmem:[%s1995_s20 + $0x608] sm:$0xff] %v1172_v22  ;;  %v1188_v22 = vmul.f32 %v932_v7, %v932_v7  ;;  %v948_v7 = vsub.f32 %v436_v60, %v692_v61  ;;  %v707_v57 = vld [vmem:[%s1973_s26 + $0x780] sm:$0xff]  ;;  %v452_v60 = vld [vmem:[%s1965_s14 + $0x788] sm:$0xff] }
 0x102   : > { %1429 = vst [vmem:[%s1995_s20 + $0x610] sm:$0xff] %v1173_v26  ;;  %v1189_v26 = vmul.f32 %v933_v11, %v933_v11  ;;  %v949_v11 = vsub.f32 %v437_v0, %v693_v1  ;;  %v708_v61 = vld [vmem:[%s1973_s26 + $0x788] sm:$0xff]  ;;  %v453_v0 = vld [vmem:[%s1965_s14 + $0x790] sm:$0xff] }
 0x103   : > { %1430 = vst [vmem:[%s1995_s20 + $0x618] sm:$0xff] %v1174_v30  ;;  %v1190_v30 = vmul.f32 %v934_v15, %v934_v15  ;;  %v950_v15 = vsub.f32 %v438_v4, %v694_v5  ;;  %v709_v1 = vld [vmem:[%s1973_s26 + $0x790] sm:$0xff]  ;;  %v454_v4 = vld [vmem:[%s1965_s14 + $0x798] sm:$0xff] }
 0x104   : > { %1431 = vst [vmem:[%s1995_s20 + $0x620] sm:$0xff] %v1175_v34  ;;  %v1191_v34 = vmul.f32 %v935_v19, %v935_v19  ;;  %v951_v19 = vsub.f32 %v439_v8, %v695_v9  ;;  %v710_v5 = vld [vmem:[%s1973_s26 + $0x798] sm:$0xff]  ;;  %v455_v8 = vld [vmem:[%s1965_s14 + $0x7a0] sm:$0xff] }
 0x105   : > { %1432 = vst [vmem:[%s1995_s20 + $0x628] sm:$0xff] %v1176_v38  ;;  %v1192_v38 = vmul.f32 %v936_v23, %v936_v23  ;;  %v952_v23 = vsub.f32 %v440_v12, %v696_v13  ;;  %v711_v9 = vld [vmem:[%s1973_s26 + $0x7a0] sm:$0xff]  ;;  %v456_v12 = vld [vmem:[%s1965_s14 + $0x7a8] sm:$0xff] }
 0x106   : > { %1433 = vst [vmem:[%s1995_s20 + $0x630] sm:$0xff] %v1177_v42  ;;  %v1193_v42 = vmul.f32 %v937_v27, %v937_v27  ;;  %v953_v27 = vsub.f32 %v441_v16, %v697_v17  ;;  %v712_v13 = vld [vmem:[%s1973_s26 + $0x7a8] sm:$0xff]  ;;  %v457_v16 = vld [vmem:[%s1965_s14 + $0x7b0] sm:$0xff] }
 0x107   : > { %1434 = vst [vmem:[%s1995_s20 + $0x638] sm:$0xff] %v1178_v46  ;;  %v1194_v46 = vmul.f32 %v938_v31, %v938_v31  ;;  %v954_v31 = vsub.f32 %v442_v20, %v698_v21  ;;  %v713_v17 = vld [vmem:[%s1973_s26 + $0x7b0] sm:$0xff]  ;;  %v458_v20 = vld [vmem:[%s1965_s14 + $0x7b8] sm:$0xff] }
 0x108   : > { %1435 = vst [vmem:[%s1995_s20 + $0x640] sm:$0xff] %v1179_v50  ;;  %v1195_v50 = vmul.f32 %v939_v35, %v939_v35  ;;  %v955_v35 = vsub.f32 %v443_v24, %v699_v25  ;;  %v714_v21 = vld [vmem:[%s1973_s26 + $0x7b8] sm:$0xff]  ;;  %v459_v24 = vld [vmem:[%s1965_s14 + $0x7c0] sm:$0xff] }
 0x109   : > { %1436 = vst [vmem:[%s1995_s20 + $0x648] sm:$0xff] %v1180_v54  ;;  %v1196_v54 = vmul.f32 %v940_v39, %v940_v39  ;;  %v956_v39 = vsub.f32 %v444_v28, %v700_v29  ;;  %v715_v25 = vld [vmem:[%s1973_s26 + $0x7c0] sm:$0xff]  ;;  %v460_v28 = vld [vmem:[%s1965_s14 + $0x7c8] sm:$0xff] }
 0x10a   : > { %1437 = vst [vmem:[%s1995_s20 + $0x650] sm:$0xff] %v1181_v58  ;;  %v1197_v58 = vmul.f32 %v941_v43, %v941_v43  ;;  %v957_v43 = vsub.f32 %v445_v32, %v701_v33  ;;  %v716_v29 = vld [vmem:[%s1973_s26 + $0x7c8] sm:$0xff]  ;;  %v461_v32 = vld [vmem:[%s1965_s14 + $0x7d0] sm:$0xff] }
 0x10b   : > { %1438 = vst [vmem:[%s1995_s20 + $0x658] sm:$0xff] %v1182_v62  ;;  %v1198_v62 = vmul.f32 %v942_v47, %v942_v47  ;;  %v958_v47 = vsub.f32 %v446_v36, %v702_v37  ;;  %v717_v33 = vld [vmem:[%s1973_s26 + $0x7d0] sm:$0xff]  ;;  %v462_v36 = vld [vmem:[%s1965_s14 + $0x7d8] sm:$0xff] }
 0x10c   : > { %1439 = vst [vmem:[%s1995_s20 + $0x660] sm:$0xff] %v1183_v2  ;;  %v1199_v2 = vmul.f32 %v943_v51, %v943_v51  ;;  %v959_v51 = vsub.f32 %v447_v40, %v703_v41  ;;  %v718_v37 = vld [vmem:[%s1973_s26 + $0x7d8] sm:$0xff]  ;;  %v463_v40 = vld [vmem:[%s1965_s14 + $0x7e0] sm:$0xff] }
 0x10d   : > { %1440 = vst [vmem:[%s1995_s20 + $0x668] sm:$0xff] %v1184_v6  ;;  %v1200_v6 = vmul.f32 %v944_v55, %v944_v55  ;;  %v960_v55 = vsub.f32 %v448_v44, %v704_v45  ;;  %v719_v41 = vld [vmem:[%s1973_s26 + $0x7e0] sm:$0xff]  ;;  %v464_v44 = vld [vmem:[%s1965_s14 + $0x7e8] sm:$0xff] }
 0x10e   : > { %1441 = vst [vmem:[%s1995_s20 + $0x670] sm:$0xff] %v1185_v10  ;;  %v1201_v10 = vmul.f32 %v945_v59, %v945_v59  ;;  %v961_v59 = vsub.f32 %v449_v48, %v705_v49  ;;  %v720_v45 = vld [vmem:[%s1973_s26 + $0x7e8] sm:$0xff]  ;;  %v465_v48 = vld [vmem:[%s1965_s14 + $0x7f0] sm:$0xff] }
 0x10f   : > { %1442 = vst [vmem:[%s1995_s20 + $0x678] sm:$0xff] %v1186_v14  ;;  %v1202_v14 = vmul.f32 %v946_v63, %v946_v63  ;;  %v962_v63 = vsub.f32 %v450_v52, %v706_v53  ;;  %v721_v49 = vld [vmem:[%s1973_s26 + $0x7f0] sm:$0xff]  ;;  %v466_v52 = vld [vmem:[%s1965_s14 + $0x7f8] sm:$0xff] }
 0x110   : > { %1443 = vst [vmem:[%s1995_s20 + $0x680] sm:$0xff] %v1187_v18  ;;  %v1203_v18 = vmul.f32 %v947_v3, %v947_v3  ;;  %v963_v3 = vsub.f32 %v451_v56, %v707_v57  ;;  %v722_v53 = vld [vmem:[%s1973_s26 + $0x7f8] sm:$0xff]  ;;  %v977_v57 = vsub.f32 %v465_v48, %v721_v49 }
 0x111   : > { %1444 = vst [vmem:[%s1995_s20 + $0x688] sm:$0xff] %v1188_v22  ;;  %v1204_v22 = vmul.f32 %v948_v7, %v948_v7  ;;  %v964_v7 = vsub.f32 %v452_v60, %v708_v61 }
 0x112   : > { %1445 = vst [vmem:[%s1995_s20 + $0x690] sm:$0xff] %v1189_v26  ;;  %v1205_v26 = vmul.f32 %v949_v11, %v949_v11  ;;  %v965_v11 = vsub.f32 %v453_v0, %v709_v1 }
 0x113   : > { %1446 = vst [vmem:[%s1995_s20 + $0x698] sm:$0xff] %v1190_v30  ;;  %v1206_v30 = vmul.f32 %v950_v15, %v950_v15  ;;  %v966_v15 = vsub.f32 %v454_v4, %v710_v5 }
 0x114   : > { %1447 = vst [vmem:[%s1995_s20 + $0x6a0] sm:$0xff] %v1191_v34  ;;  %v1207_v34 = vmul.f32 %v951_v19, %v951_v19  ;;  %v967_v19 = vsub.f32 %v455_v8, %v711_v9 }
 0x115   : > { %1448 = vst [vmem:[%s1995_s20 + $0x6a8] sm:$0xff] %v1192_v38  ;;  %v1208_v38 = vmul.f32 %v952_v23, %v952_v23  ;;  %v968_v23 = vsub.f32 %v456_v12, %v712_v13 }
 0x116   : > { %1449 = vst [vmem:[%s1995_s20 + $0x6b0] sm:$0xff] %v1193_v42  ;;  %v1209_v42 = vmul.f32 %v953_v27, %v953_v27  ;;  %v969_v27 = vsub.f32 %v457_v16, %v713_v17 }
 0x117   : > { %1450 = vst [vmem:[%s1995_s20 + $0x6b8] sm:$0xff] %v1194_v46  ;;  %v1210_v46 = vmul.f32 %v954_v31, %v954_v31  ;;  %v970_v31 = vsub.f32 %v458_v20, %v714_v21 }
 0x118   : > { %1451 = vst [vmem:[%s1995_s20 + $0x6c0] sm:$0xff] %v1195_v50  ;;  %v1211_v50 = vmul.f32 %v955_v35, %v955_v35  ;;  %v971_v35 = vsub.f32 %v459_v24, %v715_v25 }
 0x119   : > { %1452 = vst [vmem:[%s1995_s20 + $0x6c8] sm:$0xff] %v1196_v54  ;;  %v1212_v54 = vmul.f32 %v956_v39, %v956_v39  ;;  %v972_v39 = vsub.f32 %v460_v28, %v716_v29 }
 0x11a   : > { %1453 = vst [vmem:[%s1995_s20 + $0x6d0] sm:$0xff] %v1197_v58  ;;  %v1213_v58 = vmul.f32 %v957_v43, %v957_v43  ;;  %v973_v43 = vsub.f32 %v461_v32, %v717_v33 }
 0x11b   : > { %1454 = vst [vmem:[%s1995_s20 + $0x6d8] sm:$0xff] %v1198_v62  ;;  %v1214_v62 = vmul.f32 %v958_v47, %v958_v47  ;;  %v974_v47 = vsub.f32 %v462_v36, %v718_v37 }
 0x11c   : > { %1455 = vst [vmem:[%s1995_s20 + $0x6e0] sm:$0xff] %v1199_v2  ;;  %v1215_v2 = vmul.f32 %v959_v51, %v959_v51  ;;  %v975_v51 = vsub.f32 %v463_v40, %v719_v41  ;;  %v1229_v56 = vmul.f32 %v973_v43, %v973_v43 }
 0x11d   : > { %1456 = vst [vmem:[%s1995_s20 + $0x6e8] sm:$0xff] %v1200_v6  ;;  %v1216_v6 = vmul.f32 %v960_v55, %v960_v55  ;;  %v976_v55 = vsub.f32 %v464_v44, %v720_v45 }
 0x11e   : > { %1457 = vst [vmem:[%s1995_s20 + $0x6f0] sm:$0xff] %v1201_v10  ;;  %v1217_v10 = vmul.f32 %v961_v59, %v961_v59  ;;  %v978_v59 = vsub.f32 %v466_v52, %v722_v53  ;;  %v1231_v60 = vmul.f32 %v975_v51, %v975_v51 }
 0x11f   : > { %1458 = vst [vmem:[%s1995_s20 + $0x6f8] sm:$0xff] %v1202_v14  ;;  %v1218_v14 = vmul.f32 %v962_v63, %v962_v63  ;;  %v1232_v61 = vmul.f32 %v976_v55, %v976_v55 }
 0x120   : > { %1459 = vst [vmem:[%s1995_s20 + $0x700] sm:$0xff] %v1203_v18  ;;  %v1219_v18 = vmul.f32 %v963_v3, %v963_v3  ;;  %v1234_v63 = vmul.f32 %v978_v59, %v978_v59 }
 0x121   : > { %1460 = vst [vmem:[%s1995_s20 + $0x708] sm:$0xff] %v1204_v22  ;;  %v1220_v22 = vmul.f32 %v964_v7, %v964_v7 }
 0x122   : > { %1461 = vst [vmem:[%s1995_s20 + $0x710] sm:$0xff] %v1205_v26  ;;  %v1221_v26 = vmul.f32 %v965_v11, %v965_v11 }
 0x123   : > { %1462 = vst [vmem:[%s1995_s20 + $0x718] sm:$0xff] %v1206_v30  ;;  %v1222_v30 = vmul.f32 %v966_v15, %v966_v15 }
 0x124   : > { %1463 = vst [vmem:[%s1995_s20 + $0x720] sm:$0xff] %v1207_v34  ;;  %v1223_v34 = vmul.f32 %v967_v19, %v967_v19 }
 0x125   : > { %1464 = vst [vmem:[%s1995_s20 + $0x728] sm:$0xff] %v1208_v38  ;;  %v1224_v38 = vmul.f32 %v968_v23, %v968_v23 }
 0x126   : > { %1465 = vst [vmem:[%s1995_s20 + $0x730] sm:$0xff] %v1209_v42  ;;  %v1225_v42 = vmul.f32 %v969_v27, %v969_v27 }
 0x127   : > { %1466 = vst [vmem:[%s1995_s20 + $0x738] sm:$0xff] %v1210_v46  ;;  %v1226_v46 = vmul.f32 %v970_v31, %v970_v31 }
 0x128   : > { %1467 = vst [vmem:[%s1995_s20 + $0x740] sm:$0xff] %v1211_v50  ;;  %v1227_v50 = vmul.f32 %v971_v35, %v971_v35 }
 0x129   : > { %1468 = vst [vmem:[%s1995_s20 + $0x748] sm:$0xff] %v1212_v54  ;;  %v1228_v54 = vmul.f32 %v972_v39, %v972_v39 }
 0x12a   : > { %1469 = vst [vmem:[%s1995_s20 + $0x750] sm:$0xff] %v1213_v58  ;;  %v1230_v58 = vmul.f32 %v974_v47, %v974_v47 }
 0x12b   : > { %1470 = vst [vmem:[%s1995_s20 + $0x758] sm:$0xff] %v1214_v62  ;;  %v1233_v62 = vmul.f32 %v977_v57, %v977_v57 }
 0x12c   : > { %1471 = vst [vmem:[%s1995_s20 + $0x760] sm:$0xff] %v1215_v2 }
 0x12d   : > { %1472 = vst [vmem:[%s1995_s20 + $0x768] sm:$0xff] %v1216_v6 }
 0x12e   : > { %1473 = vst [vmem:[%s1995_s20 + $0x770] sm:$0xff] %v1217_v10 }
 0x12f   : > { %1474 = vst [vmem:[%s1995_s20 + $0x778] sm:$0xff] %v1218_v14 }
 0x130   : > { %1475 = vst [vmem:[%s1995_s20 + $0x780] sm:$0xff] %v1219_v18 }
 0x131   : > { %1476 = vst [vmem:[%s1995_s20 + $0x788] sm:$0xff] %v1220_v22 }
 0x132   : > { %1477 = vst [vmem:[%s1995_s20 + $0x790] sm:$0xff] %v1221_v26 }
 0x133   : > { %1478 = vst [vmem:[%s1995_s20 + $0x798] sm:$0xff] %v1222_v30 }
 0x134   : > { %1479 = vst [vmem:[%s1995_s20 + $0x7a0] sm:$0xff] %v1223_v34 }
 0x135   : > { %1480 = vst [vmem:[%s1995_s20 + $0x7a8] sm:$0xff] %v1224_v38 }
 0x136   : > { %1481 = vst [vmem:[%s1995_s20 + $0x7b0] sm:$0xff] %v1225_v42 }
 0x137   : > { %1482 = vst [vmem:[%s1995_s20 + $0x7b8] sm:$0xff] %v1226_v46 }
 0x138   : > { %1483 = vst [vmem:[%s1995_s20 + $0x7c0] sm:$0xff] %v1227_v50 }
 0x139   : > { %1484 = vst [vmem:[%s1995_s20 + $0x7c8] sm:$0xff] %v1228_v54 }
 0x13a   : > { %1485 = vst [vmem:[%s1995_s20 + $0x7d0] sm:$0xff] %v1229_v56 }
 0x13b   : > { %1486 = vst [vmem:[%s1995_s20 + $0x7d8] sm:$0xff] %v1230_v58 }
 0x13c   : > { %1487 = vst [vmem:[%s1995_s20 + $0x7e0] sm:$0xff] %v1231_v60 }
 0x13d   : > { %1488 = vst [vmem:[%s1995_s20 + $0x7e8] sm:$0xff] %v1232_v61 }
 0x13e   : > { %1489 = vst [vmem:[%s1995_s20 + $0x7f0] sm:$0xff] %v1233_v62 }
 0x13f   : > { %1490 = vst [vmem:[%s1995_s20 + $0x7f8] sm:$0xff] %v1234_v63 }
 0x140   : > { %1773 = shalt.err (!%p1770_p13)
}
 0x141   : > { %s1820_s23 = smov 512   ;;  %s1821_s7 = smov 32  }
 0x142   : > { %1635 = dma.vmem_to_hbm [thread:$0]  (%p1886_p10), %s1506_s16, 32768, %s1508_s17, %s1492_s19, %s1820_s23, %s1820_s23, %s1821_s7  }
 0x143 PF: > { %p1649_p0 = scmp.ge.s32.totalorder %s1816_s12, 2  ;;  %s1522_s14 = sand.u32 1, %s1804_s9  }
 0x144   : > { %s1523_s4 = scalar_lea.sflag [#allocation4], %s1522_s14 }
 0x145   : > { %p1645_p4 = pnand %p1649_p0, %p1890_p11 }
 0x147   : > { %p1646_p5 = pneg %p1645_p4 }
 0x149   : > { %1799 = dma.done.wait (%p1646_p5), %s1523_s4, 32768  }
 0x14a   : > { %1801 = vsyncadd (%p1646_p5), %s1523_s4, 4294934528  ;;  %p18_p7 = scmp.ge.s32.totalorder %s1862_s15, 6   ;;  %s2792_s9 = smov %s1808_s10 }
 0x14b   : > { %s2793_s10 = smov %s1812_s11  ;;  %s2794_s11 = smov %s1874_s18 }
 0x14c   : > { %s2795_s12 = smov %s1862_s15  ;;  %20 = sbr.rel (!%p18_p7) target bundleno = 7 (0x7), region = 86 }
 0x151   :  { %1529 = vsyncpa [#allocation3], 1 }
 0x152   :  { %1531 = vsyncpa [#allocation3 + $0x1], 1 }
 0x153   :  { %1532 = vsyncpa [#allocation6], 1 }
 0x154   :  { %1534 = vsyncpa [#allocation6 + $0x1], 1 }
 0x155   :  { %1535 = vsyncpa [#allocation4], 1 }
 0x156   :  { %1537 = vsyncpa [#allocation4 + $0x1], 1 }

</bundles_post_ra>
